<compile_context>
chip_gen: v7x
topology: tpu7x:2x2x1
jax: 0.10.0
libtpu: 0.0.40
codegen_flags: <defaults>
</compile_context>

<pallas_src>
import functools

import jax
import jax.numpy as jnp
from jax.experimental import pallas as pl
from jax.experimental.pallas import tpu as pltpu

HIDDEN = 768          # hardcoded in the PyTorch module (nn.Linear(768, 768))
VOCAB = 512           # "vocab_size" ctor arg (small but lane-aligned)
BATCH = 4
SEQ_LEN = 8           # wordpiece tokens per example
NUM_CHARS = 8         # characters per token (CharacterBERT feeds char ids)
CHAR_VOCAB = 64
LN_EPS = 1e-5
INV_SQRT2 = 0.7071067811865476


# ---------------------------------------------------------------------------
# Fused kernel:
#   Linear(768,768) -> GELU(erf) -> LayerNorm(768) -> Linear(768,vocab)
#   -> CrossEntropy (mean over the first `b_real` rows)
# ---------------------------------------------------------------------------
def _fused_head_ce_kernel(x_ref, w1_ref, b1_ref, g_ref, beta_ref,
                          w2_ref, b2_ref, labels_ref,
                          logits_ref, loss_ref, *, b_real):
    # ---- Linear 1 (bf16 operands, f32 accumulate on the MXU) ----
    x = x_ref[...]                                               # (Bp, H) bf16
    h = jnp.dot(x, w1_ref[...],
                preferred_element_type=jnp.float32) + b1_ref[...]  # (Bp, H) f32

    # ---- exact GELU (PyTorch nn.GELU() default, erf-based), f32 ----
    h = 0.5 * h * (1.0 + jax.lax.erf(h * jnp.float32(INV_SQRT2)))

    # ---- LayerNorm over hidden (biased variance, eps=1e-5), f32 ----
    mu = jnp.mean(h, axis=-1, keepdims=True)
    var = jnp.mean((h - mu) * (h - mu), axis=-1, keepdims=True)
    hn = (h - mu) * jax.lax.rsqrt(var + jnp.float32(LN_EPS))
    hn = hn * g_ref[...] + beta_ref[...]

    # ---- Linear 2 -> logits (bf16 operands, f32 accumulate) ----
    logits = jnp.dot(hn.astype(jnp.bfloat16), w2_ref[...],
                     preferred_element_type=jnp.float32) + b2_ref[...]
    logits_ref[...] = logits                                     # (Bp, V) f32

    # ---- CrossEntropy (mean over the b_real valid rows), f32 ----
    m = jnp.max(logits, axis=-1, keepdims=True)
    lse = jnp.log(jnp.sum(jnp.exp(logits - m), axis=-1, keepdims=True)) + m

    row = jax.lax.broadcasted_iota(jnp.int32, lse.shape, 0)
    lse_sum = jnp.sum(jnp.where(row < b_real, lse, 0.0))

    col = jax.lax.broadcasted_iota(jnp.int32, (1, logits.shape[1]), 1)
    tgt_sum = jnp.float32(0.0)
    for i in range(b_real):                      # small, static unroll
        lbl = labels_ref[i]                      # scalar int32 from SMEM
        tgt_sum = tgt_sum + jnp.sum(
            jnp.where(col == lbl, logits[i:i + 1, :], 0.0))

    loss_ref[0, 0] = (lse_sum - tgt_sum) / jnp.float32(b_real)


def rd_head_with_loss(x, labels, params):
    """x: (B, 768) f32 activations; labels: (B,) int32.  Returns (loss, logits)."""
    b, hidden = x.shape
    vocab = params["w2"].shape[1]
    b_pad = ((b + 7) // 8) * 8                   # pad M to the f32 sublane tile

    x_pad = jnp.pad(x.astype(jnp.bfloat16), ((0, b_pad - b), (0, 0)))
    labels_pad = jnp.pad(labels.astype(jnp.int32), (0, b_pad - b))

    vmem = pl.BlockSpec(memory_space=pltpu.MemorySpace.VMEM)
    smem = pl.BlockSpec(memory_space=pltpu.MemorySpace.SMEM)

    logits_pad, loss = pl.pallas_call(
        functools.partial(_fused_head_ce_kernel, b_real=b),
        out_shape=(jax.ShapeDtypeStruct((b_pad, vocab), jnp.float32),
                   jax.ShapeDtypeStruct((1, 1), jnp.float32)),
        in_specs=[vmem,            # x (bf16)
                  vmem, vmem,      # w1 (bf16), b1
                  vmem, vmem,      # ln gamma, ln beta
                  vmem, vmem,      # w2 (bf16), b2
                  smem],           # labels
        out_specs=(vmem, smem),
    )(x_pad,
      params["w1"], params["b1"].reshape(1, -1),
      params["ln_g"].reshape(1, -1), params["ln_b"].reshape(1, -1),
      params["w2"], params["b2"].reshape(1, -1),
      labels_pad)

    return loss[0, 0], logits_pad[:b]


# ---------------------------------------------------------------------------
# Synthetic CharacterBERT stand-in (plain JAX glue): character-embedding lookup
# + mean over characters, for token index 1 ONLY (all the forward consumes).
# ---------------------------------------------------------------------------
def cbert_token1_embed(input_ids, char_table):
    # input_ids: (B, L, C) int32 character ids; char_table: (CHAR_VOCAB, 768)
    ids = input_ids[:, 1]                                   # (B, C)
    emb = jnp.take(char_table, ids, axis=0)                 # (B, C, 768)
    return jnp.mean(emb, axis=1)                            # (B, 768)


# ---------------------------------------------------------------------------
# Full forward (matches CharacterBERTForRD.forward with ground_truth given)
# ---------------------------------------------------------------------------
@jax.jit
def character_bert_for_rd(input_ids, ground_truth, params):
    cls_next = cbert_token1_embed(input_ids, params["char_table"])  # embed[:, 1]
    loss, logits = rd_head_with_loss(cls_next, ground_truth, params)
    return loss, logits


def init_params(key):
    k1, k2, k3 = jax.random.split(key, 3)
    # nn.init.normal_(weight, mean=0.0, std=0.02), zero bias (as in the module)
    w1 = (0.02 * jax.random.normal(k1, (HIDDEN, HIDDEN), jnp.float32)
          ).astype(jnp.bfloat16)
    b1 = jnp.zeros((HIDDEN,), jnp.float32)
    ln_g = jnp.ones((HIDDEN,), jnp.float32)
    ln_b = jnp.zeros((HIDDEN,), jnp.float32)
    w2 = (0.02 * jax.random.normal(k2, (HIDDEN, VOCAB), jnp.float32)
          ).astype(jnp.bfloat16)
    b2 = jnp.zeros((VOCAB,), jnp.float32)
    char_table = 0.02 * jax.random.normal(k3, (CHAR_VOCAB, HIDDEN), jnp.float32)
    return dict(w1=w1, b1=b1, ln_g=ln_g, ln_b=ln_b, w2=w2, b2=b2,
                char_table=char_table)


if __name__ == "__main__":
    key = jax.random.PRNGKey(0)
    kp, ki, kl = jax.random.split(key, 3)

    params = init_params(kp)
    input_ids = jax.random.randint(ki, (BATCH, SEQ_LEN, NUM_CHARS),
                                   0, CHAR_VOCAB, dtype=jnp.int32)
    ground_truth = jax.random.randint(kl, (BATCH,), 0, VOCAB, dtype=jnp.int32)

    loss, logits = character_bert_for_rd(input_ids, ground_truth, params)
    jax.block_until_ready((loss, logits))

    # ---- pure-JAX reference of the decoder head + CE (same bf16 weight path)
    x = cbert_token1_embed(input_ids, params["char_table"])
    h = jnp.dot(x.astype(jnp.bfloat16), params["w1"],
                preferred_element_type=jnp.float32) + params["b1"]
    h = 0.5 * h * (1.0 + jax.lax.erf(h * INV_SQRT2))
    mu = h.mean(-1, keepdims=True)
    var = ((h - mu) ** 2).mean(-1, keepdims=True)
    hn = (h - mu) * jax.lax.rsqrt(var + LN_EPS) * params["ln_g"] + params["ln_b"]
    ref_logits = jnp.dot(hn.astype(jnp.bfloat16), params["w2"],
                         preferred_element_type=jnp.float32) + params["b2"]
    ref_loss = jnp.mean(
        jax.nn.logsumexp(ref_logits, axis=-1)
        - jnp.take_along_axis(ref_logits, ground_truth[:, None], axis=-1)[:, 0])

    assert jnp.allclose(logits, ref_logits, atol=2e-2, rtol=2e-2), (
        float(jnp.max(jnp.abs(logits - ref_logits))))
    assert jnp.allclose(loss, ref_loss, atol=2e-2, rtol=2e-2), (
        float(loss), float(ref_loss))

    print("KERNEL_OK")
</pallas_src>

<mosaic_0001>
module attributes {stable_mosaic.version = 11 : i64} {
  func.func @_fused_head_ce_kernel(%arg0: memref<8x768xbf16, #tpu.memory_space<vmem>>, %arg1: memref<768x768xbf16, #tpu.memory_space<vmem>>, %arg2: memref<1x768xf32, #tpu.memory_space<vmem>>, %arg3: memref<1x768xf32, #tpu.memory_space<vmem>>, %arg4: memref<1x768xf32, #tpu.memory_space<vmem>>, %arg5: memref<768x512xbf16, #tpu.memory_space<vmem>>, %arg6: memref<1x512xf32, #tpu.memory_space<vmem>>, %arg7: memref<8xi32, #tpu.memory_space<smem>>, %arg8: memref<8x512xf32, #tpu.memory_space<vmem>>, %arg9: memref<1x1xf32, #tpu.memory_space<smem>>) attributes {dimension_semantics = [], scalar_prefetch = 0 : i64, scratch_operands = 0 : i64, tpu.core_type = #tpu.core_type<tc>} {
    %c0 = arith.constant 0 : index
    %c0_0 = arith.constant 0 : index
    %0 = vector.load %arg0[%c0, %c0_0] : memref<8x768xbf16, #tpu.memory_space<vmem>>, vector<8x768xbf16>
    %c0_1 = arith.constant 0 : index
    %c0_2 = arith.constant 0 : index
    %1 = vector.load %arg1[%c0_1, %c0_2] : memref<768x768xbf16, #tpu.memory_space<vmem>>, vector<768x768xbf16>
    %cst = arith.constant dense<0.000000e+00> : vector<8x768xf32>
    %2 = tpu.matmul %0, %1, %cst {dimension_numbers = #tpu.dot_dimension_numbers<[1], [0], [0], [1], [0, 0, 1, 1], [], []>} : vector<8x768xbf16>, vector<768x768xbf16>, vector<8x768xf32> -> vector<8x768xf32>
    %c0_3 = arith.constant 0 : index
    %c0_4 = arith.constant 0 : index
    %3 = vector.load %arg2[%c0_3, %c0_4] : memref<1x768xf32, #tpu.memory_space<vmem>>, vector<1x768xf32>
    %4 = vector.broadcast %3 : vector<1x768xf32> to vector<8x768xf32>
    %5 = arith.addf %2, %4 : vector<8x768xf32>
    %cst_5 = arith.constant 5.000000e-01 : f32
    %6 = vector.broadcast %cst_5 : f32 to vector<8x768xf32>
    %7 = arith.mulf %6, %5 : vector<8x768xf32>
    %cst_6 = arith.constant 0.707106769 : f32
    %8 = vector.broadcast %cst_6 : f32 to vector<8x768xf32>
    %9 = arith.mulf %5, %8 : vector<8x768xf32>
    %10 = math.erf %9 : vector<8x768xf32>
    %cst_7 = arith.constant 1.000000e+00 : f32
    %11 = vector.broadcast %cst_7 : f32 to vector<8x768xf32>
    %12 = arith.addf %11, %10 : vector<8x768xf32>
    %13 = arith.mulf %7, %12 : vector<8x768xf32>
    %cst_8 = arith.constant dense<0.000000e+00> : vector<8xf32>
    %14 = vector.multi_reduction <add>, %13, %cst_8 [1] : vector<8x768xf32> to vector<8xf32>
    %15 = vector.shape_cast %14 : vector<8xf32> to vector<8x1xf32>
    %cst_9 = arith.constant 7.680000e+02 : f32
    %16 = vector.broadcast %cst_9 : f32 to vector<8x1xf32>
    %17 = arith.divf %15, %16 : vector<8x1xf32>
    %18 = vector.broadcast %17 : vector<8x1xf32> to vector<8x768xf32>
    %19 = arith.subf %13, %18 : vector<8x768xf32>
    %20 = vector.broadcast %17 : vector<8x1xf32> to vector<8x768xf32>
    %21 = arith.subf %13, %20 : vector<8x768xf32>
    %22 = arith.mulf %19, %21 : vector<8x768xf32>
    %cst_10 = arith.constant dense<0.000000e+00> : vector<8xf32>
    %23 = vector.multi_reduction <add>, %22, %cst_10 [1] : vector<8x768xf32> to vector<8xf32>
    %24 = vector.shape_cast %23 : vector<8xf32> to vector<8x1xf32>
    %cst_11 = arith.constant 7.680000e+02 : f32
    %25 = vector.broadcast %cst_11 : f32 to vector<8x1xf32>
    %26 = arith.divf %24, %25 : vector<8x1xf32>
    %27 = vector.broadcast %17 : vector<8x1xf32> to vector<8x768xf32>
    %28 = arith.subf %13, %27 : vector<8x768xf32>
    %cst_12 = arith.constant 9.99999974E-6 : f32
    %29 = vector.broadcast %cst_12 : f32 to vector<8x1xf32>
    %30 = arith.addf %26, %29 : vector<8x1xf32>
    %31 = math.rsqrt %30 : vector<8x1xf32>
    %32 = vector.broadcast %31 : vector<8x1xf32> to vector<8x768xf32>
    %33 = arith.mulf %28, %32 : vector<8x768xf32>
    %c0_13 = arith.constant 0 : index
    %c0_14 = arith.constant 0 : index
    %34 = vector.load %arg3[%c0_13, %c0_14] : memref<1x768xf32, #tpu.memory_space<vmem>>, vector<1x768xf32>
    %35 = vector.broadcast %34 : vector<1x768xf32> to vector<8x768xf32>
    %36 = arith.mulf %33, %35 : vector<8x768xf32>
    %c0_15 = arith.constant 0 : index
    %c0_16 = arith.constant 0 : index
    %37 = vector.load %arg4[%c0_15, %c0_16] : memref<1x768xf32, #tpu.memory_space<vmem>>, vector<1x768xf32>
    %38 = vector.broadcast %37 : vector<1x768xf32> to vector<8x768xf32>
    %39 = arith.addf %36, %38 : vector<8x768xf32>
    %40 = arith.truncf %39 : vector<8x768xf32> to vector<8x768xbf16>
    %c0_17 = arith.constant 0 : index
    %c0_18 = arith.constant 0 : index
    %41 = vector.load %arg5[%c0_17, %c0_18] : memref<768x512xbf16, #tpu.memory_space<vmem>>, vector<768x512xbf16>
    %cst_19 = arith.constant dense<0.000000e+00> : vector<8x512xf32>
    %42 = tpu.matmul %40, %41, %cst_19 {dimension_numbers = #tpu.dot_dimension_numbers<[1], [0], [0], [1], [0, 0, 1, 1], [], []>} : vector<8x768xbf16>, vector<768x512xbf16>, vector<8x512xf32> -> vector<8x512xf32>
    %c0_20 = arith.constant 0 : index
    %c0_21 = arith.constant 0 : index
    %43 = vector.load %arg6[%c0_20, %c0_21] : memref<1x512xf32, #tpu.memory_space<vmem>>, vector<1x512xf32>
    %44 = vector.broadcast %43 : vector<1x512xf32> to vector<8x512xf32>
    %45 = arith.addf %42, %44 : vector<8x512xf32>
    %c0_22 = arith.constant 0 : index
    %c0_23 = arith.constant 0 : index
    %46 = vector.load %arg8[%c0_22, %c0_23] : memref<8x512xf32, #tpu.memory_space<vmem>>, vector<8x512xf32>
    tpu.vector_store %arg8[%c0_22, %c0_23], %45 {strides = array<i32>} : memref<8x512xf32, #tpu.memory_space<vmem>>, vector<8x512xf32>,
    %cst_24 = arith.constant dense<0xFF800000> : vector<8xf32>
    %47 = vector.multi_reduction <maximumf>, %45, %cst_24 [1] : vector<8x512xf32> to vector<8xf32>
    %48 = vector.shape_cast %47 : vector<8xf32> to vector<8x1xf32>
    %49 = vector.broadcast %48 : vector<8x1xf32> to vector<8x512xf32>
    %50 = arith.subf %45, %49 : vector<8x512xf32>
    %51 = math.exp %50 : vector<8x512xf32>
    %cst_25 = arith.constant dense<0.000000e+00> : vector<8xf32>
    %52 = vector.multi_reduction <add>, %51, %cst_25 [1] : vector<8x512xf32> to vector<8xf32>
    %53 = vector.shape_cast %52 : vector<8xf32> to vector<8x1xf32>
    %54 = math.log %53 : vector<8x1xf32>
    %55 = arith.addf %54, %48 : vector<8x1xf32>
    %56 = tpu.iota {dimensions = array<i32: 0>} : vector<8x1xi32>
    %c4_i32 = arith.constant 4 : i32
    %57 = vector.broadcast %c4_i32 : i32 to vector<8x1xi32>
    %58 = arith.cmpi slt, %56, %57 : vector<8x1xi32>
    %cst_26 = arith.constant 0.000000e+00 : f32
    %59 = vector.broadcast %cst_26 : f32 to vector<8x1xf32>
    %60 = arith.select %58, %55, %59 : vector<8x1xi1>, vector<8x1xf32>
    %61 = vector.shape_cast %60 : vector<8x1xf32> to vector<1x8x1xf32>
    %cst_27 = arith.constant dense<0.000000e+00> : vector<1xf32>
    %62 = vector.multi_reduction <add>, %61, %cst_27 [1, 2] : vector<1x8x1xf32> to vector<1xf32>
    %63 = vector.shape_cast %62 : vector<1xf32> to vector<1x1x1xf32>
    %64 = vector.extract %63[0, 0, 0] : f32 from vector<1x1x1xf32>
    %65 = tpu.iota {dimensions = array<i32: 1>} : vector<1x512xi32>
    %c0_28 = arith.constant 0 : index
    %66 = memref.load %arg7[%c0_28] : memref<8xi32, #tpu.memory_space<smem>>
    %67 = vector.broadcast %66 : i32 to vector<1x512xi32>
    %68 = arith.cmpi eq, %65, %67 : vector<1x512xi32>
    %69 = vector.extract_strided_slice %45 {offsets = [0, 0], sizes = [1, 512], strides = [1, 1]} : vector<8x512xf32> to vector<1x512xf32>
    %cst_29 = arith.constant 0.000000e+00 : f32
    %70 = vector.broadcast %cst_29 : f32 to vector<1x512xf32>
    %71 = arith.select %68, %69, %70 : vector<1x512xi1>, vector<1x512xf32>
    %72 = vector.shape_cast %71 : vector<1x512xf32> to vector<1x1x512xf32>
    %cst_30 = arith.constant dense<0.000000e+00> : vector<1xf32>
    %73 = vector.multi_reduction <add>, %72, %cst_30 [1, 2] : vector<1x1x512xf32> to vector<1xf32>
    %74 = vector.shape_cast %73 : vector<1xf32> to vector<1x1x1xf32>
    %75 = vector.extract %74[0, 0, 0] : f32 from vector<1x1x1xf32>
    %cst_31 = arith.constant 0.000000e+00 : f32
    %76 = arith.addf %cst_31, %75 : f32
    %c1 = arith.constant 1 : index
    %77 = memref.load %arg7[%c1] : memref<8xi32, #tpu.memory_space<smem>>
    %78 = vector.broadcast %77 : i32 to vector<1x512xi32>
    %79 = arith.cmpi eq, %65, %78 : vector<1x512xi32>
    %80 = vector.extract_strided_slice %45 {offsets = [1, 0], sizes = [1, 512], strides = [1, 1]} : vector<8x512xf32> to vector<1x512xf32>
    %cst_32 = arith.constant 0.000000e+00 : f32
    %81 = vector.broadcast %cst_32 : f32 to vector<1x512xf32>
    %82 = arith.select %79, %80, %81 : vector<1x512xi1>, vector<1x512xf32>
    %83 = vector.shape_cast %82 : vector<1x512xf32> to vector<1x1x512xf32>
    %cst_33 = arith.constant dense<0.000000e+00> : vector<1xf32>
    %84 = vector.multi_reduction <add>, %83, %cst_33 [1, 2] : vector<1x1x512xf32> to vector<1xf32>
    %85 = vector.shape_cast %84 : vector<1xf32> to vector<1x1x1xf32>
    %86 = vector.extract %85[0, 0, 0] : f32 from vector<1x1x1xf32>
    %87 = arith.addf %76, %86 : f32
    %c2 = arith.constant 2 : index
    %88 = memref.load %arg7[%c2] : memref<8xi32, #tpu.memory_space<smem>>
    %89 = vector.broadcast %88 : i32 to vector<1x512xi32>
    %90 = arith.cmpi eq, %65, %89 : vector<1x512xi32>
    %91 = vector.extract_strided_slice %45 {offsets = [2, 0], sizes = [1, 512], strides = [1, 1]} : vector<8x512xf32> to vector<1x512xf32>
    %cst_34 = arith.constant 0.000000e+00 : f32
    %92 = vector.broadcast %cst_34 : f32 to vector<1x512xf32>
    %93 = arith.select %90, %91, %92 : vector<1x512xi1>, vector<1x512xf32>
    %94 = vector.shape_cast %93 : vector<1x512xf32> to vector<1x1x512xf32>
    %cst_35 = arith.constant dense<0.000000e+00> : vector<1xf32>
    %95 = vector.multi_reduction <add>, %94, %cst_35 [1, 2] : vector<1x1x512xf32> to vector<1xf32>
    %96 = vector.shape_cast %95 : vector<1xf32> to vector<1x1x1xf32>
    %97 = vector.extract %96[0, 0, 0] : f32 from vector<1x1x1xf32>
    %98 = arith.addf %87, %97 : f32
    %c3 = arith.constant 3 : index
    %99 = memref.load %arg7[%c3] : memref<8xi32, #tpu.memory_space<smem>>
    %100 = vector.broadcast %99 : i32 to vector<1x512xi32>
    %101 = arith.cmpi eq, %65, %100 : vector<1x512xi32>
    %102 = vector.extract_strided_slice %45 {offsets = [3, 0], sizes = [1, 512], strides = [1, 1]} : vector<8x512xf32> to vector<1x512xf32>
    %cst_36 = arith.constant 0.000000e+00 : f32
    %103 = vector.broadcast %cst_36 : f32 to vector<1x512xf32>
    %104 = arith.select %101, %102, %103 : vector<1x512xi1>, vector<1x512xf32>
    %105 = vector.shape_cast %104 : vector<1x512xf32> to vector<1x1x512xf32>
    %cst_37 = arith.constant dense<0.000000e+00> : vector<1xf32>
    %106 = vector.multi_reduction <add>, %105, %cst_37 [1, 2] : vector<1x1x512xf32> to vector<1xf32>
    %107 = vector.shape_cast %106 : vector<1xf32> to vector<1x1x1xf32>
    %108 = vector.extract %107[0, 0, 0] : f32 from vector<1x1x1xf32>
    %109 = arith.addf %98, %108 : f32
    %110 = arith.subf %64, %109 : f32
    %cst_38 = arith.constant 4.000000e+00 : f32
    %111 = arith.divf %110, %cst_38 : f32
    %c0_39 = arith.constant 0 : index
    %c0_40 = arith.constant 0 : index
    %112 = memref.load %arg9[%c0_39, %c0_40] : memref<1x1xf32, #tpu.memory_space<smem>>
    memref.store %111, %arg9[%c0_39, %c0_40] : memref<1x1xf32, #tpu.memory_space<smem>>
    return
  }
}

</mosaic_0001>

<bundles_post_ra>
// kernel: character_bert_for_rd.1
= control target key start
LH: loop header
LB: loop body
LE: loop exit
PB: predicated region body
PF: predicated region fallthrough
CT: control target
= control target key end

     0   :  { %15 = vsyncpa [#allocation3], 0  ;;  %s6369_s0 = inlined_call_operand.vmem [shape: bf16[8,768], index: 0, kind: input, shape index: {}]   ;;  %s6370_s1 = inlined_call_operand.hbm [shape: bf16[768,768], index: 1, kind: input, shape index: {}]   ;;  %s6371_s2 = inlined_call_operand.vmem [shape: f32[1,768], index: 2, kind: input, shape index: {}]   ;;  %s6372_s3 = inlined_call_operand.vmem [shape: f32[1,768], index: 3, kind: input, shape index: {}]   ;;  %s6373_s4 = inlined_call_operand.vmem [shape: f32[1,768], index: 4, kind: input, shape index: {}]   ;;  %s6374_s5 = inlined_call_operand.vmem [shape: bf16[768,512], index: 5, kind: input, shape index: {}]   ;;  %s6375_s6 = inlined_call_operand.hbm [shape: f32[1,512], index: 6, kind: input, shape index: {}]   ;;  %s6376_s7 = inlined_call_operand.vmem [shape: s32[8], index: 7, kind: input, shape index: {}]   ;;  %s6377_s8 = inlined_call_operand.vmem [shape: f32[8,512], index: 8, kind: output, shape index: {0}]   ;;  %s6378_s9 = inlined_call_operand.hbm [shape: f32[1,1], index: 9, kind: output, shape index: {1}]  }
   0x1   :  { %16 = vsyncpa [#allocation7], 0 }
   0x2   :  { %17 = vsyncpa [#allocation5], 0 }
   0x3   :  { %18 = vsyncpa [#allocation4], 0  ;;  %s5390_s30 = smov [#allocation2]   ;;  %s5316_s13 = scalar_lea.hbm %s6370_s1, 36864 }
   0x4   :  { %s26_s10 = sshll.u32 %s5390_s30, 4  ;;  %p5317_p0 = scmp.ne.s32.totalorder %s6370_s1, %s5316_s13  ;;  %s27_s10 = int_to_ptr.vmem [resolvable:$true] %s26_s10 }
   0x5   :  { %p5320_p1 = scmp.lt.u32.totalorder %s5316_s13, %s6370_s1 }
   0x7   :  { %p5322_p2 = pnand %p5320_p1, %p5317_p0 }
   0x9   :  { %5325 = shalt.err (!%p5322_p2)
}
   0xa   :  { %s5326_s18 = scalar_lea.vmem %s27_s10, 36864  ;;  %p5331_p4 = scmp.lt.s32.totalorder %s27_s10, %s27_s10 }
   0xb   :  { %p5327_p3 = scmp.ne.s32.totalorder %s27_s10, %s5326_s18  ;;  %p5332_p5 = scmp.lt.s32.totalorder %s5326_s18, %s5326_s18 }
   0xd   :  { %p5333_p6 = por %p5332_p5, %p5331_p4 }
   0xf   :  { %p5334_p7 = pnand %p5333_p6, %p5327_p3 }
  0x11   :  { %5337 = shalt.err (!%p5334_p7)
}
  0x12   :  { %s5391_s19 = smov 384   ;;  %s5392_s20 = smov 24  }
  0x13   :  { %32 = dma.hbm_to_vmem [thread:$0]  %s6370_s1, 36864, %s27_s10, [#allocation3], %s5391_s19, %s5391_s19, %s5392_s20  }
  0x14   :  { %s5393_s23 = smov [#allocation6]   ;;  %s57_s27 = sshll.u32 %s6376_s7, 4  ;;  %s58_s27 = int_to_ptr.vmem [resolvable:$true] %s57_s27 }
  0x15   :  { %s47_s24 = sshll.u32 %s5393_s23, 4  ;;  %s5338_s30 = scalar_lea.hbm %s6375_s6, 64  ;;  %s48_s24 = int_to_ptr.vmem [resolvable:$true] %s47_s24 }
  0x16   :  { %p5339_p8 = scmp.ne.s32.totalorder %s6375_s6, %s5338_s30  ;;  %p5342_p9 = scmp.lt.u32.totalorder %s5338_s30, %s6375_s6 }
  0x18   :  { %p5344_p10 = pnand %p5342_p9, %p5339_p8 }
  0x1a   :  { %5347 = shalt.err (!%p5344_p10)
}
  0x1b   :  { %s5348_s1 = scalar_lea.vmem %s48_s24, 64  ;;  %p5353_p12 = scmp.lt.s32.totalorder %s48_s24, %s48_s24 }
  0x1c   :  { %p5349_p11 = scmp.ne.s32.totalorder %s48_s24, %s5348_s1  ;;  %p5354_p13 = scmp.lt.s32.totalorder %s5348_s1, %s5348_s1 }
  0x1e   :  { %p5355_p0 = por %p5354_p13, %p5353_p12 }
  0x20   :  { %p5356_p1 = pnand %p5355_p0, %p5349_p11 }
  0x22   :  { %5359 = shalt.err (!%p5356_p1)
}
  0x23   :  { %50 = dma.hbm_to_vmem [thread:$0]  %s6375_s6, 64, %s48_s24, [#allocation7]  }
  0x24   :  { %s5360_s15 = scalar_lea.vmem %s58_s27, 16  ;;  %p5365_p3 = scmp.lt.s32.totalorder %s58_s27, %s58_s27 }
  0x25   :  { %p5361_p2 = scmp.ne.s32.totalorder %s58_s27, %s5360_s15  ;;  %p5366_p4 = scmp.lt.s32.totalorder %s5360_s15, %s5360_s15 }
  0x27   :  { %p5367_p5 = por %p5366_p4, %p5365_p3 }
  0x29   :  { %p5368_p6 = pnand %p5367_p5, %p5361_p2 }
  0x2b   :  { %5371 = shalt.err (!%p5368_p6)
}
  0x2c   :  { %s5394_s16 = smov [#allocation8]  }
  0x2d   :  { %60 = dma.vmem_to_smem %s58_s27, 16, %s5394_s16, [#allocation5]  }
  0x2e   :  { %5382 = dma.done.wait [#allocation3], 36864  }
  0x2f   :  { %5383 = vsyncadd [#allocation3], 4294930432 }
  0x30   :  { %5384 = dma.done.wait [#allocation7], 64  }
  0x31   :  { %5385 = vsyncadd [#allocation7], 4294967232 }
  0x32   :  { %5386 = dma.done.wait [#allocation5], 16  }
  0x33   :  { %5387 = vsyncadd [#allocation5], 4294967280 }
  0x34   :  { %70 = sfence }
  0x35   :  { %v4566_v0 = vld [vmem:[#allocation2 + $0x4] ss:$24 sps:$4 sm:$0xff]   ;;  %v4570_v2 = vld [vmem:[#allocation2] ss:$24 sps:$4 sm:$0xff]   ;;  %v4572_v4 = vld [vmem:[#allocation2 + $0x34] ss:$24 sps:$4 sm:$0xff]  }
  0x36   :  { %v4568_v1 = vld [vmem:[#allocation2 + $0x304] ss:$24 sps:$4 sm:$0xff]   ;;  %1855 = vmatprep.subr.bf16.mxu1 %v4566_v0  ;;  %v4571_v3 = vld [vmem:[#allocation2 + $0x300] ss:$24 sps:$4 sm:$0xff]   ;;  %v4574_v5 = vld [vmem:[#allocation2 + $0x334] ss:$24 sps:$4 sm:$0xff]  }
  0x37   :  { %1896 = vmatprep.subr.bf16.mxu0 %v4568_v1  ;;  %1856 = vmatpush1.bf16.msra.mxu1 %v4570_v2  ;;  %v4576_v6 = vld [vmem:[#allocation2 + $0x30] ss:$24 sps:$4 sm:$0xff]   ;;  %v4578_v8 = vld [vmem:[#allocation2 + $0x64] ss:$24 sps:$4 sm:$0xff]   ;;  %v4582_v10 = vld [vmem:[#allocation2 + $0x60] ss:$24 sps:$4 sm:$0xff]  }
  0x38   :  { %1897 = vmatpush1.bf16.msra.mxu0 %v4571_v3  ;;  %1857 = vmatprep.subr.bf16.mxu1 %v4572_v4  ;;  %v4577_v7 = vld [vmem:[#allocation2 + $0x330] ss:$24 sps:$4 sm:$0xff]   ;;  %v4580_v9 = vld [vmem:[#allocation2 + $0x364] ss:$24 sps:$4 sm:$0xff]   ;;  %v4583_v11 = vld [vmem:[#allocation2 + $0x360] ss:$24 sps:$4 sm:$0xff]  }
  0x39   :  { %1898 = vmatprep.subr.bf16.mxu0 %v4574_v5  ;;  %v4584_v12 = vld [vmem:[#allocation2 + $0x94] ss:$24 sps:$4 sm:$0xff]   ;;  %v4588_v14 = vld [vmem:[#allocation2 + $0x90] ss:$24 sps:$4 sm:$0xff]   ;;  %v4590_v16 = vld [vmem:[#allocation2 + $0xc4] ss:$24 sps:$4 sm:$0xff]  }
  0x3a   :  { %v4586_v13 = vld [vmem:[#allocation2 + $0x394] ss:$24 sps:$4 sm:$0xff]   ;;  %v4589_v15 = vld [vmem:[#allocation2 + $0x390] ss:$24 sps:$4 sm:$0xff]   ;;  %v4592_v17 = vld [vmem:[#allocation2 + $0x3c4] ss:$24 sps:$4 sm:$0xff]  }
  0x3b   :  { %1858 = vmatpush1.bf16.msra.mxu1 %v4576_v6  ;;  %v4594_v18 = vld [vmem:[#allocation2 + $0xc0] ss:$24 sps:$4 sm:$0xff]   ;;  %v4596_v20 = vld [vmem:[#allocation2 + $0xf4] ss:$24 sps:$4 sm:$0xff]   ;;  %v4600_v22 = vld [vmem:[#allocation2 + $0xf0] ss:$24 sps:$4 sm:$0xff]  }
  0x3c   :  { %1899 = vmatpush1.bf16.msra.mxu0 %v4577_v7  ;;  %1859 = vmatprep.subr.bf16.mxu1 %v4578_v8  ;;  %v4595_v19 = vld [vmem:[#allocation2 + $0x3c0] ss:$24 sps:$4 sm:$0xff]   ;;  %v4598_v21 = vld [vmem:[#allocation2 + $0x3f4] ss:$24 sps:$4 sm:$0xff]   ;;  %v4601_v23 = vld [vmem:[#allocation2 + $0x3f0] ss:$24 sps:$4 sm:$0xff]  }
  0x3d   :  { %1900 = vmatprep.subr.bf16.mxu0 %v4580_v9  ;;  %v4602_v24 = vld [vmem:[#allocation2 + $0x124] ss:$24 sps:$4 sm:$0xff]   ;;  %v4606_v26 = vld [vmem:[#allocation2 + $0x120] ss:$24 sps:$4 sm:$0xff]   ;;  %v4608_v28 = vld [vmem:[#allocation2 + $0x154] ss:$24 sps:$4 sm:$0xff]  }
  0x3e   :  { %v4604_v25 = vld [vmem:[#allocation2 + $0x424] ss:$24 sps:$4 sm:$0xff]   ;;  %v4607_v27 = vld [vmem:[#allocation2 + $0x420] ss:$24 sps:$4 sm:$0xff]   ;;  %v4610_v29 = vld [vmem:[#allocation2 + $0x454] ss:$24 sps:$4 sm:$0xff]  }
  0x3f   :  { %1860 = vmatpush1.bf16.msra.mxu1 %v4582_v10  ;;  %v4612_v30 = vld [vmem:[#allocation2 + $0x150] ss:$24 sps:$4 sm:$0xff]   ;;  %v4614_v32 = vld [vmem:[#allocation2 + $0x184] ss:$24 sps:$4 sm:$0xff]   ;;  %v4618_v34 = vld [vmem:[#allocation2 + $0x180] ss:$24 sps:$4 sm:$0xff]  }
  0x40   :  { %1901 = vmatpush1.bf16.msra.mxu0 %v4583_v11  ;;  %1861 = vmatprep.subr.bf16.mxu1 %v4584_v12  ;;  %v4613_v31 = vld [vmem:[#allocation2 + $0x450] ss:$24 sps:$4 sm:$0xff]   ;;  %v4616_v33 = vld [vmem:[#allocation2 + $0x484] ss:$24 sps:$4 sm:$0xff]   ;;  %v4619_v35 = vld [vmem:[#allocation2 + $0x480] ss:$24 sps:$4 sm:$0xff]  }
  0x41   :  { %1902 = vmatprep.subr.bf16.mxu0 %v4586_v13  ;;  %v4620_v36 = vld [vmem:[#allocation2 + $0x1b4] ss:$24 sps:$4 sm:$0xff]   ;;  %v4624_v38 = vld [vmem:[#allocation2 + $0x1b0] ss:$24 sps:$4 sm:$0xff]   ;;  %v4626_v40 = vld [vmem:[#allocation2 + $0x1e4] ss:$24 sps:$4 sm:$0xff]  }
  0x42   :  { %v4622_v37 = vld [vmem:[#allocation2 + $0x4b4] ss:$24 sps:$4 sm:$0xff]   ;;  %v4625_v39 = vld [vmem:[#allocation2 + $0x4b0] ss:$24 sps:$4 sm:$0xff]   ;;  %v4628_v41 = vld [vmem:[#allocation2 + $0x4e4] ss:$24 sps:$4 sm:$0xff]  }
  0x43   :  { %1862 = vmatpush1.bf16.msra.mxu1 %v4588_v14  ;;  %v4630_v42 = vld [vmem:[#allocation2 + $0x1e0] ss:$24 sps:$4 sm:$0xff]   ;;  %v4632_v44 = vld [vmem:[#allocation2 + $0x214] ss:$24 sps:$4 sm:$0xff]   ;;  %v4636_v49 = vld [vmem:[#allocation2 + $0x210] ss:$24 sps:$4 sm:$0xff]  }
  0x44   :  { %1903 = vmatpush1.bf16.msra.mxu0 %v4589_v15  ;;  %1863 = vmatprep.subr.bf16.mxu1 %v4590_v16  ;;  %v4631_v43 = vld [vmem:[#allocation2 + $0x4e0] ss:$24 sps:$4 sm:$0xff]   ;;  %v4634_v45 = vld [vmem:[#allocation2 + $0x514] ss:$24 sps:$4 sm:$0xff]   ;;  %v4637_v50 = vld [vmem:[#allocation2 + $0x510] ss:$24 sps:$4 sm:$0xff]  }
  0x45   :  { %1904 = vmatprep.subr.bf16.mxu0 %v4592_v17  ;;  %v71_v46 = vld [vmem:[%s6369_s0] sm:$0xff]  ;;  %v72_v48 = vld [vmem:[%s6369_s0 + $0x8] sm:$0xff]  ;;  %v4677_v11 = vld [vmem:[#allocation2 + $0x3c] ss:$24 sps:$4 sm:$0xff]   ;;  %s4500_s28 = sld [smem:[#allocation8 + $0x2]]  ;;  %s4501_s29 = sld [smem:[#allocation8 + $0x3]] }
  0x46   :  { %v5476_v47 = vcombine.high %v71_v46, %v71_v46  ;;  %v5481_v51 = vcombine.high %v72_v48, %v72_v48  ;;  %v4638_v52 = vld [vmem:[#allocation2 + $0x244] ss:$24 sps:$4 sm:$0xff]   ;;  %v4642_v54 = vld [vmem:[#allocation2 + $0x240] ss:$24 sps:$4 sm:$0xff]   ;;  %v4644_v56 = vld [vmem:[#allocation2 + $0x274] ss:$24 sps:$4 sm:$0xff]   ;;  %v5485_v6 = vcombine.low %v71_v46, %v71_v46  ;;  %v5487_v7 = vcombine.low %v72_v48, %v72_v48 }
  0x47   :  { %1864 = vmatpush1.bf16.msra.mxu1 %v4594_v18  ;;  %v4640_v53 = vld [vmem:[#allocation2 + $0x544] ss:$24 sps:$4 sm:$0xff]   ;;  %v4643_v55 = vld [vmem:[#allocation2 + $0x540] ss:$24 sps:$4 sm:$0xff]   ;;  %v4646_v57 = vld [vmem:[#allocation2 + $0x574] ss:$24 sps:$4 sm:$0xff]  }
  0x48   :  { %1905 = vmatpush1.bf16.msra.mxu0 %v4595_v19  ;;  %1865 = vmatprep.subr.bf16.mxu1 %v4596_v20  ;;  %v4648_v58 = vld [vmem:[#allocation2 + $0x270] ss:$24 sps:$4 sm:$0xff]   ;;  %v4650_v60 = vld [vmem:[#allocation2 + $0x2a4] ss:$24 sps:$4 sm:$0xff]   ;;  %v4654_v62 = vld [vmem:[#allocation2 + $0x2a0] ss:$24 sps:$4 sm:$0xff]  }
  0x49   :  { %1906 = vmatprep.subr.bf16.mxu0 %v4598_v21  ;;  %1887 = vmatprep.mubr.bf16.mxu1 %v5476_v47  ;;  %v4649_v59 = vld [vmem:[#allocation2 + $0x570] ss:$24 sps:$4 sm:$0xff]   ;;  %v4652_v61 = vld [vmem:[#allocation2 + $0x5a4] ss:$24 sps:$4 sm:$0xff]   ;;  %v4655_v63 = vld [vmem:[#allocation2 + $0x5a0] ss:$24 sps:$4 sm:$0xff]  }
  0x4a   :  { %1928 = vmatprep.mubr.bf16.mxu0 %v5481_v51  ;;  %v4656_v0 = vld [vmem:[#allocation2 + $0x2d4] ss:$24 sps:$4 sm:$0xff]   ;;  %v4660_v2 = vld [vmem:[#allocation2 + $0x2d0] ss:$24 sps:$4 sm:$0xff]   ;;  %v4666_v4 = vld [vmem:[#allocation2 + $0x604] ss:$24 sps:$4 sm:$0xff]  }
  0x4b   :  { %1866 = vmatpush1.bf16.msra.mxu1 %v4600_v22  ;;  %v4658_v1 = vld [vmem:[#allocation2 + $0x5d4] ss:$24 sps:$4 sm:$0xff]   ;;  %v4661_v3 = vld [vmem:[#allocation2 + $0x5d0] ss:$24 sps:$4 sm:$0xff]   ;;  %v4664_v8 = vld [vmem:[#allocation2 + $0x600] ss:$24 sps:$4 sm:$0xff]  }
  0x4c   :  { %1907 = vmatpush1.bf16.msra.mxu0 %v4601_v23  ;;  %1867 = vmatprep.subr.bf16.mxu1 %v4602_v24  ;;  %v4669_v5 = vld [vmem:[#allocation2 + $0xc] ss:$24 sps:$4 sm:$0xff]   ;;  %v4667_v9 = vld [vmem:[#allocation2 + $0x8] ss:$24 sps:$4 sm:$0xff]   ;;  %v4675_v13 = vld [vmem:[#allocation2 + $0x38] ss:$24 sps:$4 sm:$0xff]  }
  0x4d   :  { %1908 = vmatprep.subr.bf16.mxu0 %v4604_v25  ;;  %v4674_v10 = vld [vmem:[#allocation2 + $0x634] ss:$24 sps:$4 sm:$0xff]   ;;  %v4672_v12 = vld [vmem:[#allocation2 + $0x630] ss:$24 sps:$4 sm:$0xff]   ;;  %v4680_v14 = vld [vmem:[#allocation2 + $0x664] ss:$24 sps:$4 sm:$0xff]  }
  0x4e   :  { %v4683_v15 = vld [vmem:[#allocation2 + $0x6c] ss:$24 sps:$4 sm:$0xff]   ;;  %v4678_v16 = vld [vmem:[#allocation2 + $0x660] ss:$24 sps:$4 sm:$0xff]   ;;  %v4689_v19 = vld [vmem:[#allocation2 + $0x9c] ss:$24 sps:$4 sm:$0xff]  }
  0x4f   :  { %1868 = vmatpush1.bf16.msra.mxu1 %v4606_v26  ;;  %v4681_v17 = vld [vmem:[#allocation2 + $0x68] ss:$24 sps:$4 sm:$0xff]   ;;  %v4686_v18 = vld [vmem:[#allocation2 + $0x694] ss:$24 sps:$4 sm:$0xff]   ;;  %v4687_v21 = vld [vmem:[#allocation2 + $0x98] ss:$24 sps:$4 sm:$0xff]  }
  0x50   :  { %1909 = vmatpush1.bf16.msra.mxu0 %v4607_v27  ;;  %1869 = vmatprep.subr.bf16.mxu1 %v4608_v28  ;;  %v4684_v20 = vld [vmem:[#allocation2 + $0x690] ss:$24 sps:$4 sm:$0xff]   ;;  %v4692_v22 = vld [vmem:[#allocation2 + $0x6c4] ss:$24 sps:$4 sm:$0xff]   ;;  %v4690_v24 = vld [vmem:[#allocation2 + $0x6c0] ss:$24 sps:$4 sm:$0xff]  }
  0x51   :  { %1910 = vmatprep.subr.bf16.mxu0 %v4610_v29  ;;  %v4695_v23 = vld [vmem:[#allocation2 + $0xcc] ss:$24 sps:$4 sm:$0xff]   ;;  %v4693_v25 = vld [vmem:[#allocation2 + $0xc8] ss:$24 sps:$4 sm:$0xff]   ;;  %v4701_v27 = vld [vmem:[#allocation2 + $0xfc] ss:$24 sps:$4 sm:$0xff]  }
  0x52   :  { %v4698_v26 = vld [vmem:[#allocation2 + $0x6f4] ss:$24 sps:$4 sm:$0xff]   ;;  %v4696_v28 = vld [vmem:[#allocation2 + $0x6f0] ss:$24 sps:$4 sm:$0xff]   ;;  %vm3852_vm0 = vcmask 1040384  }
  0x53   :  { %1870 = vmatpush1.bf16.msra.mxu1 %v4612_v30  ;;  %v4699_v29 = vld [vmem:[#allocation2 + $0xf8] ss:$24 sps:$4 sm:$0xff]   ;;  %v4704_v30 = vld [vmem:[#allocation2 + $0x724] ss:$24 sps:$4 sm:$0xff]  }
  0x54   :  { %1911 = vmatpush1.bf16.msra.mxu0 %v4613_v31  ;;  %1871 = vmatprep.subr.bf16.mxu1 %v4614_v32  ;;  %v4707_v31 = vld [vmem:[#allocation2 + $0x12c] ss:$24 sps:$4 sm:$0xff]   ;;  %v5495_v32 = vld [vmem:[%s6369_s0 + $0x10] sm:$0xff] }
  0x55   :  { %1912 = vmatprep.subr.bf16.mxu0 %v4616_v33  ;;  %v4702_v33 = vld [vmem:[#allocation2 + $0x720] ss:$24 sps:$4 sm:$0xff]   ;;  %v4720_v46 = vld [vmem:[#allocation2 + $0x7b0] ss:$24 sps:$4 sm:$0xff]  }
  0x56   :  { %v4723_v48 = vld [vmem:[#allocation2 + $0x1b8] ss:$24 sps:$4 sm:$0xff]  }
  0x57   :  { %1872 = vmatpush1.bf16.msra.mxu1 %v4618_v34  ;;  %v5499_v34 = vcombine.high %v5495_v32, %v5495_v32 }
  0x58   :  { %1913 = vmatpush1.bf16.msra.mxu0 %v4619_v35  ;;  %1873 = vmatprep.subr.bf16.mxu1 %v4620_v36  ;;  %v4705_v35 = vld [vmem:[#allocation2 + $0x128] ss:$24 sps:$4 sm:$0xff]   ;;  %v4710_v36 = vld [vmem:[#allocation2 + $0x754] ss:$24 sps:$4 sm:$0xff]  }
  0x59   :  { %1914 = vmatprep.subr.bf16.mxu0 %v4622_v37  ;;  %v4713_v37 = vld [vmem:[#allocation2 + $0x15c] ss:$24 sps:$4 sm:$0xff]  }
  0x5b   :  { %1874 = vmatpush1.bf16.msra.mxu1 %v4624_v38  ;;  %v4708_v38 = vld [vmem:[#allocation2 + $0x750] ss:$24 sps:$4 sm:$0xff]  }
  0x5c   :  { %1915 = vmatpush1.bf16.msra.mxu0 %v4625_v39  ;;  %1875 = vmatprep.subr.bf16.mxu1 %v4626_v40  ;;  %v4711_v39 = vld [vmem:[#allocation2 + $0x158] ss:$24 sps:$4 sm:$0xff]   ;;  %v4716_v40 = vld [vmem:[#allocation2 + $0x784] ss:$24 sps:$4 sm:$0xff]  }
  0x5d   :  { %1916 = vmatprep.subr.bf16.mxu0 %v4628_v41  ;;  %v4719_v41 = vld [vmem:[#allocation2 + $0x18c] ss:$24 sps:$4 sm:$0xff]  }
  0x5f   :  { %1876 = vmatpush1.bf16.msra.mxu1 %v4630_v42  ;;  %v4714_v42 = vld [vmem:[#allocation2 + $0x780] ss:$24 sps:$4 sm:$0xff]  }
  0x60   :  { %1917 = vmatpush1.bf16.msra.mxu0 %v4631_v43  ;;  %1877 = vmatprep.subr.bf16.mxu1 %v4632_v44  ;;  %v4717_v43 = vld [vmem:[#allocation2 + $0x188] ss:$24 sps:$4 sm:$0xff]   ;;  %v4722_v44 = vld [vmem:[#allocation2 + $0x7b4] ss:$24 sps:$4 sm:$0xff]  }
  0x61   :  { %1918 = vmatprep.subr.bf16.mxu0 %v4634_v45  ;;  %v4725_v45 = vld [vmem:[#allocation2 + $0x1bc] ss:$24 sps:$4 sm:$0xff]  }
  0x63   :  { %1878 = vmatpush1.bf16.msra.mxu1 %v4636_v49  ;;  %v4728_v49 = vld [vmem:[#allocation2 + $0x7e4] ss:$24 sps:$4 sm:$0xff]  }
  0x64   :  { %1919 = vmatpush1.bf16.msra.mxu0 %v4637_v50  ;;  %1879 = vmatprep.subr.bf16.mxu1 %v4638_v52  ;;  %v4731_v50 = vld [vmem:[#allocation2 + $0x1ec] ss:$24 sps:$4 sm:$0xff]   ;;  %v4726_v52 = vld [vmem:[#allocation2 + $0x7e0] ss:$24 sps:$4 sm:$0xff]  }
  0x65   :  { %1920 = vmatprep.subr.bf16.mxu0 %v4640_v53  ;;  %v4729_v53 = vld [vmem:[#allocation2 + $0x1e8] ss:$24 sps:$4 sm:$0xff]  }
  0x67   :  { %1880 = vmatpush1.bf16.msra.mxu1 %v4642_v54  ;;  %v4734_v54 = vld [vmem:[#allocation2 + $0x814] ss:$24 sps:$4 sm:$0xff]  }
  0x68   :  { %1921 = vmatpush1.bf16.msra.mxu0 %v4643_v55  ;;  %1881 = vmatprep.subr.bf16.mxu1 %v4644_v56  ;;  %v4737_v55 = vld [vmem:[#allocation2 + $0x21c] ss:$24 sps:$4 sm:$0xff]   ;;  %v4732_v56 = vld [vmem:[#allocation2 + $0x810] ss:$24 sps:$4 sm:$0xff]  }
  0x69   :  { %1922 = vmatprep.subr.bf16.mxu0 %v4646_v57  ;;  %v4735_v57 = vld [vmem:[#allocation2 + $0x218] ss:$24 sps:$4 sm:$0xff]  }
  0x6b   :  { %1882 = vmatpush1.bf16.msra.mxu1 %v4648_v58  ;;  %v4740_v58 = vld [vmem:[#allocation2 + $0x844] ss:$24 sps:$4 sm:$0xff]  }
  0x6c   :  { %1923 = vmatpush1.bf16.msra.mxu0 %v4649_v59  ;;  %1883 = vmatprep.subr.bf16.mxu1 %v4650_v60  ;;  %v4743_v59 = vld [vmem:[#allocation2 + $0x24c] ss:$24 sps:$4 sm:$0xff]   ;;  %v4738_v60 = vld [vmem:[#allocation2 + $0x840] ss:$24 sps:$4 sm:$0xff]  }
  0x6d   :  { %1924 = vmatprep.subr.bf16.mxu0 %v4652_v61  ;;  %v4741_v61 = vld [vmem:[#allocation2 + $0x248] ss:$24 sps:$4 sm:$0xff]  }
  0x6f   :  { %1884 = vmatpush1.bf16.msra.mxu1 %v4654_v62  ;;  %v4746_v62 = vld [vmem:[#allocation2 + $0x874] ss:$24 sps:$4 sm:$0xff]  }
  0x70   :  { %1925 = vmatpush1.bf16.msra.mxu0 %v4655_v63  ;;  %1885 = vmatprep.subr.bf16.mxu1 %v4656_v0  ;;  %v4749_v63 = vld [vmem:[#allocation2 + $0x27c] ss:$24 sps:$4 sm:$0xff]   ;;  %v4744_v0 = vld [vmem:[#allocation2 + $0x870] ss:$24 sps:$4 sm:$0xff]  }
  0x71   :  { %1926 = vmatprep.subr.bf16.mxu0 %v4658_v1  ;;  %v4747_v1 = vld [vmem:[#allocation2 + $0x278] ss:$24 sps:$4 sm:$0xff]  }
  0x73   :  { %1886 = vmatpush1.bf16.msra.mxu1 %v4660_v2  ;;  %v4752_v2 = vld [vmem:[#allocation2 + $0x8a4] ss:$24 sps:$4 sm:$0xff]  }
  0x74   :  { %1927 = vmatpush1.bf16.msra.mxu0 %v4661_v3  ;;  %1978 = vmatprep.subr.bf16.mxu1 %v4669_v5  ;;  %v4755_v3 = vld [vmem:[#allocation2 + $0x2ac] ss:$24 sps:$4 sm:$0xff]   ;;  %v4753_v5 = vld [vmem:[#allocation2 + $0x2a8] ss:$24 sps:$4 sm:$0xff]  }
  0x75   :  { %1937 = vmatprep.subr.bf16.mxu0 %v4666_v4  ;;  %v4750_v4 = vld [vmem:[#allocation2 + $0x8a0] ss:$24 sps:$4 sm:$0xff]  }
  0x76   :  { %1888 = vmatmul.mubr.bf16.vlgmr.msra.gmra.mrb[0].mxu1 %v5485_v6 }
  0x77   :  { %1929 = vmatmul.mubr.bf16.vlgmr.msra.gmra.mrb[0].mxu0 %v5487_v7  ;;  %1979 = vmatpush1.bf16.msra.mxu1 %v4667_v9  ;;  %v4761_v9 = vld [vmem:[#allocation2 + $0x2dc] ss:$24 sps:$4 sm:$0xff]  }
  0x78   :  { %1938 = vmatpush1.bf16.msra.mxu0 %v4664_v8  ;;  %1980 = vmatprep.subr.bf16.mxu1 %v4677_v11  ;;  %v4758_v8 = vld [vmem:[#allocation2 + $0x8d4] ss:$24 sps:$4 sm:$0xff]   ;;  %v4759_v11 = vld [vmem:[#allocation2 + $0x2d8] ss:$24 sps:$4 sm:$0xff]  }
  0x79   :  { %1939 = vmatprep.subr.bf16.mxu0 %v4674_v10  ;;  %2010 = vmatprep.mubr.bf16.mxu1 %v5476_v47  ;;  %v4756_v10 = vld [vmem:[#allocation2 + $0x8d0] ss:$24 sps:$4 sm:$0xff]  }
  0x7a   :  { %1969 = vmatprep.mubr.bf16.mxu0 %v5499_v34 }
  0x7b   :  { %1981 = vmatpush1.bf16.msra.mxu1 %v4675_v13  ;;  %v4769_v13 = vld [vmem:[#allocation2 + $0x14] ss:$24 sps:$4 sm:$0xff]  }
  0x7c   :  { %1940 = vmatpush1.bf16.msra.mxu0 %v4672_v12  ;;  %1982 = vmatprep.subr.bf16.mxu1 %v4683_v15  ;;  %v4766_v12 = vld [vmem:[#allocation2 + $0x30c] ss:$24 sps:$4 sm:$0xff]   ;;  %v4764_v15 = vld [vmem:[#allocation2 + $0x308] ss:$24 sps:$4 sm:$0xff]  }
  0x7d   :  { %1941 = vmatprep.subr.bf16.mxu0 %v4680_v14  ;;  %v5504_v14 = vcombine.low %v5495_v32, %v5495_v32  ;;  %v4796_v32 = vld [vmem:[#allocation2 + $0x3fc] ss:$24 sps:$4 sm:$0xff]  }
  0x7f   :  { %1983 = vmatpush1.bf16.msra.mxu1 %v4681_v17  ;;  %v4772_v17 = vld [vmem:[#allocation2 + $0x33c] ss:$24 sps:$4 sm:$0xff]  }
  0x80   :  { %1942 = vmatpush1.bf16.msra.mxu0 %v4678_v16  ;;  %1984 = vmatprep.subr.bf16.mxu1 %v4689_v19  ;;  %v4767_v16 = vld [vmem:[#allocation2 + $0x10] ss:$24 sps:$4 sm:$0xff]  }
  0x81   :  { %1943 = vmatprep.subr.bf16.mxu0 %v4686_v18  ;;  %v4775_v18 = vld [vmem:[#allocation2 + $0x44] ss:$24 sps:$4 sm:$0xff]   ;;  %v4770_v19 = vld [vmem:[#allocation2 + $0x338] ss:$24 sps:$4 sm:$0xff]  }
  0x83   :  { %1985 = vmatpush1.bf16.msra.mxu1 %v4687_v21  ;;  %v4778_v21 = vld [vmem:[#allocation2 + $0x36c] ss:$24 sps:$4 sm:$0xff]  }
  0x84   :  { %1944 = vmatpush1.bf16.msra.mxu0 %v4684_v20  ;;  %1986 = vmatprep.subr.bf16.mxu1 %v4695_v23  ;;  %v4773_v20 = vld [vmem:[#allocation2 + $0x40] ss:$24 sps:$4 sm:$0xff]  }
  0x85   :  { %1945 = vmatprep.subr.bf16.mxu0 %v4692_v22  ;;  %v4781_v22 = vld [vmem:[#allocation2 + $0x74] ss:$24 sps:$4 sm:$0xff]   ;;  %v4776_v23 = vld [vmem:[#allocation2 + $0x368] ss:$24 sps:$4 sm:$0xff]  }
  0x87   :  { %1987 = vmatpush1.bf16.msra.mxu1 %v4693_v25  ;;  %v4784_v25 = vld [vmem:[#allocation2 + $0x39c] ss:$24 sps:$4 sm:$0xff]  }
  0x88   :  { %1946 = vmatpush1.bf16.msra.mxu0 %v4690_v24  ;;  %1988 = vmatprep.subr.bf16.mxu1 %v4701_v27  ;;  %v4779_v24 = vld [vmem:[#allocation2 + $0x70] ss:$24 sps:$4 sm:$0xff]  }
  0x89   :  { %1947 = vmatprep.subr.bf16.mxu0 %v4698_v26  ;;  %v4787_v26 = vld [vmem:[#allocation2 + $0xa4] ss:$24 sps:$4 sm:$0xff]   ;;  %v4782_v27 = vld [vmem:[#allocation2 + $0x398] ss:$24 sps:$4 sm:$0xff]  }
  0x8b   :  { %1989 = vmatpush1.bf16.msra.mxu1 %v4699_v29  ;;  %v4790_v29 = vld [vmem:[#allocation2 + $0x3cc] ss:$24 sps:$4 sm:$0xff]  }
  0x8c   :  { %1948 = vmatpush1.bf16.msra.mxu0 %v4696_v28  ;;  %1990 = vmatprep.subr.bf16.mxu1 %v4707_v31  ;;  %v4785_v28 = vld [vmem:[#allocation2 + $0xa0] ss:$24 sps:$4 sm:$0xff]  }
  0x8d   :  { %1949 = vmatprep.subr.bf16.mxu0 %v4704_v30  ;;  %v4793_v30 = vld [vmem:[#allocation2 + $0xd4] ss:$24 sps:$4 sm:$0xff]   ;;  %v4788_v31 = vld [vmem:[#allocation2 + $0x3c8] ss:$24 sps:$4 sm:$0xff]  }
  0x8f   :  { %1991 = vmatpush1.bf16.msra.mxu1 %v4705_v35  ;;  %v4794_v35 = vld [vmem:[#allocation2 + $0x3f8] ss:$24 sps:$4 sm:$0xff]  }
  0x90   :  { %1950 = vmatpush1.bf16.msra.mxu0 %v4702_v33  ;;  %1992 = vmatprep.subr.bf16.mxu1 %v4713_v37  ;;  %v4799_v33 = vld [vmem:[#allocation2 + $0x104] ss:$24 sps:$4 sm:$0xff]  }
  0x91   :  { %1951 = vmatprep.subr.bf16.mxu0 %v4710_v36  ;;  %v4797_v36 = vld [vmem:[#allocation2 + $0x100] ss:$24 sps:$4 sm:$0xff]   ;;  %v4802_v37 = vld [vmem:[#allocation2 + $0x42c] ss:$24 sps:$4 sm:$0xff]  }
  0x93   :  { %1993 = vmatpush1.bf16.msra.mxu1 %v4711_v39  ;;  %v4800_v39 = vld [vmem:[#allocation2 + $0x428] ss:$24 sps:$4 sm:$0xff]  }
  0x94   :  { %1952 = vmatpush1.bf16.msra.mxu0 %v4708_v38  ;;  %1994 = vmatprep.subr.bf16.mxu1 %v4719_v41  ;;  %v4805_v38 = vld [vmem:[#allocation2 + $0x134] ss:$24 sps:$4 sm:$0xff]  }
  0x95   :  { %1953 = vmatprep.subr.bf16.mxu0 %v4716_v40  ;;  %v4803_v40 = vld [vmem:[#allocation2 + $0x130] ss:$24 sps:$4 sm:$0xff]   ;;  %v4808_v41 = vld [vmem:[#allocation2 + $0x45c] ss:$24 sps:$4 sm:$0xff]  }
  0x97   :  { %1995 = vmatpush1.bf16.msra.mxu1 %v4717_v43  ;;  %v4806_v43 = vld [vmem:[#allocation2 + $0x458] ss:$24 sps:$4 sm:$0xff]  }
  0x98   :  { %1954 = vmatpush1.bf16.msra.mxu0 %v4714_v42  ;;  %1996 = vmatprep.subr.bf16.mxu1 %v4725_v45  ;;  %v4811_v42 = vld [vmem:[#allocation2 + $0x164] ss:$24 sps:$4 sm:$0xff]  }
  0x99   :  { %1955 = vmatprep.subr.bf16.mxu0 %v4722_v44  ;;  %v4809_v44 = vld [vmem:[#allocation2 + $0x160] ss:$24 sps:$4 sm:$0xff]   ;;  %v4814_v45 = vld [vmem:[#allocation2 + $0x48c] ss:$24 sps:$4 sm:$0xff]  }
  0x9b   :  { %1997 = vmatpush1.bf16.msra.mxu1 %v4723_v48  ;;  %v4812_v48 = vld [vmem:[#allocation2 + $0x488] ss:$24 sps:$4 sm:$0xff]  }
  0x9c   :  { %1956 = vmatpush1.bf16.msra.mxu0 %v4720_v46  ;;  %1998 = vmatprep.subr.bf16.mxu1 %v4731_v50  ;;  %v4817_v46 = vld [vmem:[#allocation2 + $0x194] ss:$24 sps:$4 sm:$0xff]  }
  0x9d   :  { %1957 = vmatprep.subr.bf16.mxu0 %v4728_v49  ;;  %v4815_v49 = vld [vmem:[#allocation2 + $0x190] ss:$24 sps:$4 sm:$0xff]   ;;  %v4820_v50 = vld [vmem:[#allocation2 + $0x4bc] ss:$24 sps:$4 sm:$0xff]  }
  0x9f   :  { %1999 = vmatpush1.bf16.msra.mxu1 %v4729_v53  ;;  %v4818_v53 = vld [vmem:[#allocation2 + $0x4b8] ss:$24 sps:$4 sm:$0xff]  }
  0xa0   :  { %1958 = vmatpush1.bf16.msra.mxu0 %v4726_v52  ;;  %2000 = vmatprep.subr.bf16.mxu1 %v4737_v55  ;;  %v4823_v52 = vld [vmem:[#allocation2 + $0x1c4] ss:$24 sps:$4 sm:$0xff]  }
  0xa1   :  { %1959 = vmatprep.subr.bf16.mxu0 %v4734_v54  ;;  %v4821_v54 = vld [vmem:[#allocation2 + $0x1c0] ss:$24 sps:$4 sm:$0xff]   ;;  %v4826_v55 = vld [vmem:[#allocation2 + $0x4ec] ss:$24 sps:$4 sm:$0xff]  }
  0xa3   :  { %2001 = vmatpush1.bf16.msra.mxu1 %v4735_v57  ;;  %v4824_v57 = vld [vmem:[#allocation2 + $0x4e8] ss:$24 sps:$4 sm:$0xff]  }
  0xa4   :  { %1960 = vmatpush1.bf16.msra.mxu0 %v4732_v56  ;;  %2002 = vmatprep.subr.bf16.mxu1 %v4743_v59  ;;  %v4829_v56 = vld [vmem:[#allocation2 + $0x1f4] ss:$24 sps:$4 sm:$0xff]  }
  0xa5   :  { %1961 = vmatprep.subr.bf16.mxu0 %v4740_v58  ;;  %v4827_v58 = vld [vmem:[#allocation2 + $0x1f0] ss:$24 sps:$4 sm:$0xff]   ;;  %v4832_v59 = vld [vmem:[#allocation2 + $0x51c] ss:$24 sps:$4 sm:$0xff]  }
  0xa7   :  { %2003 = vmatpush1.bf16.msra.mxu1 %v4741_v61  ;;  %v4830_v61 = vld [vmem:[#allocation2 + $0x518] ss:$24 sps:$4 sm:$0xff]  }
  0xa8   :  { %1962 = vmatpush1.bf16.msra.mxu0 %v4738_v60  ;;  %2004 = vmatprep.subr.bf16.mxu1 %v4749_v63  ;;  %v4835_v60 = vld [vmem:[#allocation2 + $0x224] ss:$24 sps:$4 sm:$0xff]  }
  0xa9   :  { %1963 = vmatprep.subr.bf16.mxu0 %v4746_v62  ;;  %v4833_v62 = vld [vmem:[#allocation2 + $0x220] ss:$24 sps:$4 sm:$0xff]   ;;  %v4838_v63 = vld [vmem:[#allocation2 + $0x54c] ss:$24 sps:$4 sm:$0xff]  }
  0xab   :  { %2005 = vmatpush1.bf16.msra.mxu1 %v4747_v1  ;;  %v4836_v1 = vld [vmem:[#allocation2 + $0x548] ss:$24 sps:$4 sm:$0xff]  }
  0xac   :  { %1964 = vmatpush1.bf16.msra.mxu0 %v4744_v0  ;;  %2006 = vmatprep.subr.bf16.mxu1 %v4755_v3  ;;  %v4841_v0 = vld [vmem:[#allocation2 + $0x254] ss:$24 sps:$4 sm:$0xff]  }
  0xad   :  { %1965 = vmatprep.subr.bf16.mxu0 %v4752_v2  ;;  %v4839_v2 = vld [vmem:[#allocation2 + $0x250] ss:$24 sps:$4 sm:$0xff]   ;;  %v4844_v3 = vld [vmem:[#allocation2 + $0x57c] ss:$24 sps:$4 sm:$0xff]  }
  0xaf   :  { %2007 = vmatpush1.bf16.msra.mxu1 %v4753_v5  ;;  %v4842_v5 = vld [vmem:[#allocation2 + $0x578] ss:$24 sps:$4 sm:$0xff]  }
  0xb0   :  { %1966 = vmatpush1.bf16.msra.mxu0 %v4750_v4  ;;  %2008 = vmatprep.subr.bf16.mxu1 %v4761_v9  ;;  %v4847_v4 = vld [vmem:[#allocation2 + $0x284] ss:$24 sps:$4 sm:$0xff]  }
  0xb1   :  { %1967 = vmatprep.subr.bf16.mxu0 %v4758_v8  ;;  %v4845_v8 = vld [vmem:[#allocation2 + $0x280] ss:$24 sps:$4 sm:$0xff]   ;;  %v4850_v9 = vld [vmem:[#allocation2 + $0x5ac] ss:$24 sps:$4 sm:$0xff]  }
  0xb3   :  { %2009 = vmatpush1.bf16.msra.mxu1 %v4759_v11  ;;  %v4848_v11 = vld [vmem:[#allocation2 + $0x5a8] ss:$24 sps:$4 sm:$0xff]  }
  0xb4   :  { %1968 = vmatpush1.bf16.msra.mxu0 %v4756_v10  ;;  %2019 = vmatprep.subr.bf16.mxu1 %v4766_v12  ;;  %v4853_v10 = vld [vmem:[#allocation2 + $0x2b4] ss:$24 sps:$4 sm:$0xff]   ;;  %v4851_v12 = vld [vmem:[#allocation2 + $0x2b0] ss:$24 sps:$4 sm:$0xff]  }
  0xb5   :  { %2101 = vmatprep.subr.bf16.mxu0 %v4769_v13  ;;  %v4856_v13 = vld [vmem:[#allocation2 + $0x5dc] ss:$24 sps:$4 sm:$0xff]  }
  0xb6   :  { %2011 = vmatmul.mubr.bf16.vlgmr.msra.gmra.mrb[4].mxu1 %v5485_v6 }
  0xb7   :  { %1970 = vmatmul.mubr.bf16.vlgmr.msra.gmra.mrb[0].mxu0 %v5504_v14  ;;  %2020 = vmatpush1.bf16.msra.mxu1 %v4764_v15  ;;  %v4859_v15 = vld [vmem:[#allocation2 + $0x2e4] ss:$24 sps:$4 sm:$0xff]  }
  0xb8   :  { %2102 = vmatpush1.bf16.msra.mxu0 %v4767_v16  ;;  %2021 = vmatprep.subr.bf16.mxu1 %v4772_v17  ;;  %v4854_v16 = vld [vmem:[#allocation2 + $0x5d8] ss:$24 sps:$4 sm:$0xff]  }
  0xb9   :  { %2103 = vmatprep.subr.bf16.mxu0 %v4775_v18  ;;  %2051 = vmatprep.mubr.bf16.mxu1 %v5481_v51  ;;  %v4857_v17 = vld [vmem:[#allocation2 + $0x2e0] ss:$24 sps:$4 sm:$0xff]   ;;  %v4862_v18 = vld [vmem:[#allocation2 + $0x60c] ss:$24 sps:$4 sm:$0xff]  }
  0xba   :  { %2133 = vmatprep.mubr.bf16.mxu0 %v5476_v47  ;;  %v4791_v47 = vld [vmem:[#allocation2 + $0xd0] ss:$24 sps:$4 sm:$0xff]  }
  0xbb   :  { %2022 = vmatpush1.bf16.msra.mxu1 %v4770_v19  ;;  %v4865_v19 = vld [vmem:[#allocation2 + $0x314] ss:$24 sps:$4 sm:$0xff]  }
  0xbc   :  { %2104 = vmatpush1.bf16.msra.mxu0 %v4773_v20  ;;  %2023 = vmatprep.subr.bf16.mxu1 %v4778_v21  ;;  %v4860_v20 = vld [vmem:[#allocation2 + $0x608] ss:$24 sps:$4 sm:$0xff]  }
  0xbd   :  { %2105 = vmatprep.subr.bf16.mxu0 %v4781_v22  ;;  %v4863_v21 = vld [vmem:[#allocation2 + $0x310] ss:$24 sps:$4 sm:$0xff]   ;;  %v4868_v22 = vld [vmem:[#allocation2 + $0x63c] ss:$24 sps:$4 sm:$0xff]  }
  0xbf   :  { %2024 = vmatpush1.bf16.msra.mxu1 %v4776_v23  ;;  %v4871_v23 = vld [vmem:[#allocation2 + $0x344] ss:$24 sps:$4 sm:$0xff]  }
  0xc0   :  { %2106 = vmatpush1.bf16.msra.mxu0 %v4779_v24  ;;  %2025 = vmatprep.subr.bf16.mxu1 %v4784_v25  ;;  %v4866_v24 = vld [vmem:[#allocation2 + $0x638] ss:$24 sps:$4 sm:$0xff]  }
  0xc1   :  { %2107 = vmatprep.subr.bf16.mxu0 %v4787_v26  ;;  %v4869_v25 = vld [vmem:[#allocation2 + $0x340] ss:$24 sps:$4 sm:$0xff]   ;;  %v4874_v26 = vld [vmem:[#allocation2 + $0x66c] ss:$24 sps:$4 sm:$0xff]  }
  0xc3   :  { %2026 = vmatpush1.bf16.msra.mxu1 %v4782_v27  ;;  %v4877_v27 = vld [vmem:[#allocation2 + $0x374] ss:$24 sps:$4 sm:$0xff]  }
  0xc4   :  { %2108 = vmatpush1.bf16.msra.mxu0 %v4785_v28  ;;  %2027 = vmatprep.subr.bf16.mxu1 %v4790_v29  ;;  %v4872_v28 = vld [vmem:[#allocation2 + $0x668] ss:$24 sps:$4 sm:$0xff]  }
  0xc5   :  { %2109 = vmatprep.subr.bf16.mxu0 %v4793_v30  ;;  %v4875_v29 = vld [vmem:[#allocation2 + $0x370] ss:$24 sps:$4 sm:$0xff]   ;;  %v4880_v30 = vld [vmem:[#allocation2 + $0x69c] ss:$24 sps:$4 sm:$0xff]  }
  0xc7   :  { %2028 = vmatpush1.bf16.msra.mxu1 %v4788_v31  ;;  %v4883_v31 = vld [vmem:[#allocation2 + $0x3a4] ss:$24 sps:$4 sm:$0xff]  }
  0xc8   :  { %2110 = vmatpush1.bf16.msra.mxu0 %v4791_v47  ;;  %2029 = vmatprep.subr.bf16.mxu1 %v4796_v32  ;;  %v4878_v47 = vld [vmem:[#allocation2 + $0x698] ss:$24 sps:$4 sm:$0xff]   ;;  %v4886_v32 = vld [vmem:[#allocation2 + $0x6cc] ss:$24 sps:$4 sm:$0xff]  }
  0xc9   :  { %2111 = vmatprep.subr.bf16.mxu0 %v4799_v33  ;;  %v4889_v33 = vld [vmem:[#allocation2 + $0x3d4] ss:$24 sps:$4 sm:$0xff]  }
  0xcb   :  { %2030 = vmatpush1.bf16.msra.mxu1 %v4794_v35  ;;  %v4884_v35 = vld [vmem:[#allocation2 + $0x6c8] ss:$24 sps:$4 sm:$0xff]  }
  0xcc   :  { %2112 = vmatpush1.bf16.msra.mxu0 %v4797_v36  ;;  %2031 = vmatprep.subr.bf16.mxu1 %v4802_v37  ;;  %v4887_v36 = vld [vmem:[#allocation2 + $0x3d0] ss:$24 sps:$4 sm:$0xff]   ;;  %v4892_v37 = vld [vmem:[#allocation2 + $0x6fc] ss:$24 sps:$4 sm:$0xff]  }
  0xcd   :  { %2113 = vmatprep.subr.bf16.mxu0 %v4805_v38  ;;  %v4895_v38 = vld [vmem:[#allocation2 + $0x404] ss:$24 sps:$4 sm:$0xff]  }
  0xcf   :  { %2032 = vmatpush1.bf16.msra.mxu1 %v4800_v39  ;;  %v4893_v39 = vld [vmem:[#allocation2 + $0x400] ss:$24 sps:$4 sm:$0xff]  }
  0xd0   :  { %2114 = vmatpush1.bf16.msra.mxu0 %v4803_v40  ;;  %2033 = vmatprep.subr.bf16.mxu1 %v4808_v41  ;;  %v4898_v40 = vld [vmem:[#allocation2 + $0x72c] ss:$24 sps:$4 sm:$0xff]  }
  0xd1   :  { %2115 = vmatprep.subr.bf16.mxu0 %v4811_v42  ;;  %v4901_v41 = vld [vmem:[#allocation2 + $0x434] ss:$24 sps:$4 sm:$0xff]   ;;  %v4896_v42 = vld [vmem:[#allocation2 + $0x728] ss:$24 sps:$4 sm:$0xff]  }
  0xd3   :  { %2034 = vmatpush1.bf16.msra.mxu1 %v4806_v43  ;;  %v4899_v43 = vld [vmem:[#allocation2 + $0x430] ss:$24 sps:$4 sm:$0xff]  }
  0xd4   :  { %2116 = vmatpush1.bf16.msra.mxu0 %v4809_v44  ;;  %2035 = vmatprep.subr.bf16.mxu1 %v4814_v45  ;;  %v4904_v44 = vld [vmem:[#allocation2 + $0x75c] ss:$24 sps:$4 sm:$0xff]  }
  0xd5   :  { %2117 = vmatprep.subr.bf16.mxu0 %v4817_v46  ;;  %v4907_v45 = vld [vmem:[#allocation2 + $0x464] ss:$24 sps:$4 sm:$0xff]   ;;  %v4902_v46 = vld [vmem:[#allocation2 + $0x758] ss:$24 sps:$4 sm:$0xff]  }
  0xd7   :  { %2036 = vmatpush1.bf16.msra.mxu1 %v4812_v48  ;;  %v4905_v48 = vld [vmem:[#allocation2 + $0x460] ss:$24 sps:$4 sm:$0xff]  }
  0xd8   :  { %2118 = vmatpush1.bf16.msra.mxu0 %v4815_v49  ;;  %2037 = vmatprep.subr.bf16.mxu1 %v4820_v50  ;;  %v4910_v49 = vld [vmem:[#allocation2 + $0x78c] ss:$24 sps:$4 sm:$0xff]  }
  0xd9   :  { %2119 = vmatprep.subr.bf16.mxu0 %v4823_v52  ;;  %v4913_v50 = vld [vmem:[#allocation2 + $0x494] ss:$24 sps:$4 sm:$0xff]   ;;  %v4908_v52 = vld [vmem:[#allocation2 + $0x788] ss:$24 sps:$4 sm:$0xff]  }
  0xdb   :  { %2038 = vmatpush1.bf16.msra.mxu1 %v4818_v53  ;;  %v4911_v53 = vld [vmem:[#allocation2 + $0x490] ss:$24 sps:$4 sm:$0xff]  }
  0xdc   :  { %2120 = vmatpush1.bf16.msra.mxu0 %v4821_v54  ;;  %2039 = vmatprep.subr.bf16.mxu1 %v4826_v55  ;;  %v4916_v54 = vld [vmem:[#allocation2 + $0x7bc] ss:$24 sps:$4 sm:$0xff]  }
  0xdd   :  { %2121 = vmatprep.subr.bf16.mxu0 %v4829_v56  ;;  %v4919_v55 = vld [vmem:[#allocation2 + $0x4c4] ss:$24 sps:$4 sm:$0xff]   ;;  %v4914_v56 = vld [vmem:[#allocation2 + $0x7b8] ss:$24 sps:$4 sm:$0xff]  }
  0xdf   :  { %2040 = vmatpush1.bf16.msra.mxu1 %v4824_v57  ;;  %v4917_v57 = vld [vmem:[#allocation2 + $0x4c0] ss:$24 sps:$4 sm:$0xff]  }
  0xe0   :  { %2122 = vmatpush1.bf16.msra.mxu0 %v4827_v58  ;;  %2041 = vmatprep.subr.bf16.mxu1 %v4832_v59  ;;  %v4922_v58 = vld [vmem:[#allocation2 + $0x7ec] ss:$24 sps:$4 sm:$0xff]  }
  0xe1   :  { %2123 = vmatprep.subr.bf16.mxu0 %v4835_v60  ;;  %v4925_v59 = vld [vmem:[#allocation2 + $0x4f4] ss:$24 sps:$4 sm:$0xff]   ;;  %v4920_v60 = vld [vmem:[#allocation2 + $0x7e8] ss:$24 sps:$4 sm:$0xff]  }
  0xe3   :  { %2042 = vmatpush1.bf16.msra.mxu1 %v4830_v61  ;;  %v4923_v61 = vld [vmem:[#allocation2 + $0x4f0] ss:$24 sps:$4 sm:$0xff]  }
  0xe4   :  { %2124 = vmatpush1.bf16.msra.mxu0 %v4833_v62  ;;  %2043 = vmatprep.subr.bf16.mxu1 %v4838_v63  ;;  %v4928_v62 = vld [vmem:[#allocation2 + $0x81c] ss:$24 sps:$4 sm:$0xff]  }
  0xe5   :  { %2125 = vmatprep.subr.bf16.mxu0 %v4841_v0  ;;  %v4931_v63 = vld [vmem:[#allocation2 + $0x524] ss:$24 sps:$4 sm:$0xff]   ;;  %v4926_v0 = vld [vmem:[#allocation2 + $0x818] ss:$24 sps:$4 sm:$0xff]  }
  0xe7   :  { %2044 = vmatpush1.bf16.msra.mxu1 %v4836_v1  ;;  %v4929_v1 = vld [vmem:[#allocation2 + $0x520] ss:$24 sps:$4 sm:$0xff]  }
  0xe8   :  { %2126 = vmatpush1.bf16.msra.mxu0 %v4839_v2  ;;  %2045 = vmatprep.subr.bf16.mxu1 %v4844_v3  ;;  %v4934_v2 = vld [vmem:[#allocation2 + $0x84c] ss:$24 sps:$4 sm:$0xff]  }
  0xe9   :  { %2127 = vmatprep.subr.bf16.mxu0 %v4847_v4  ;;  %v4937_v3 = vld [vmem:[#allocation2 + $0x554] ss:$24 sps:$4 sm:$0xff]   ;;  %v4932_v4 = vld [vmem:[#allocation2 + $0x848] ss:$24 sps:$4 sm:$0xff]  }
  0xeb   :  { %2046 = vmatpush1.bf16.msra.mxu1 %v4842_v5  ;;  %v4935_v5 = vld [vmem:[#allocation2 + $0x550] ss:$24 sps:$4 sm:$0xff]  }
  0xec   :  { %2128 = vmatpush1.bf16.msra.mxu0 %v4845_v8  ;;  %2047 = vmatprep.subr.bf16.mxu1 %v4850_v9  ;;  %v4940_v8 = vld [vmem:[#allocation2 + $0x87c] ss:$24 sps:$4 sm:$0xff]  }
  0xed   :  { %2129 = vmatprep.subr.bf16.mxu0 %v4853_v10  ;;  %v4943_v9 = vld [vmem:[#allocation2 + $0x584] ss:$24 sps:$4 sm:$0xff]   ;;  %v4938_v10 = vld [vmem:[#allocation2 + $0x878] ss:$24 sps:$4 sm:$0xff]  }
  0xef   :  { %2048 = vmatpush1.bf16.msra.mxu1 %v4848_v11  ;;  %v4941_v11 = vld [vmem:[#allocation2 + $0x580] ss:$24 sps:$4 sm:$0xff]  }
  0xf0   :  { %2130 = vmatpush1.bf16.msra.mxu0 %v4851_v12  ;;  %2049 = vmatprep.subr.bf16.mxu1 %v4856_v13  ;;  %v4946_v12 = vld [vmem:[#allocation2 + $0x8ac] ss:$24 sps:$4 sm:$0xff]  }
  0xf1   :  { %2131 = vmatprep.subr.bf16.mxu0 %v4859_v15  ;;  %v4949_v13 = vld [vmem:[#allocation2 + $0x5b4] ss:$24 sps:$4 sm:$0xff]   ;;  %v4944_v15 = vld [vmem:[#allocation2 + $0x8a8] ss:$24 sps:$4 sm:$0xff]  }
  0xf3   :  { %2050 = vmatpush1.bf16.msra.mxu1 %v4854_v16  ;;  %v4947_v16 = vld [vmem:[#allocation2 + $0x5b0] ss:$24 sps:$4 sm:$0xff]  }
  0xf4   :  { %2132 = vmatpush1.bf16.msra.mxu0 %v4857_v17  ;;  %2060 = vmatprep.subr.bf16.mxu1 %v4862_v18  ;;  %v4952_v17 = vld [vmem:[#allocation2 + $0x8dc] ss:$24 sps:$4 sm:$0xff]  }
  0xf5   :  { %2142 = vmatprep.subr.bf16.mxu0 %v4865_v19  ;;  %v4955_v18 = vld [vmem:[#allocation2 + $0x5e4] ss:$24 sps:$4 sm:$0xff]   ;;  %v4950_v19 = vld [vmem:[#allocation2 + $0x8d8] ss:$24 sps:$4 sm:$0xff]  }
  0xf6   :  { %2052 = vmatmul.mubr.bf16.vlgmr.msra.gmra.mrb[4].mxu1 %v5487_v7 }
  0xf7   :  { %2134 = vmatmul.mubr.bf16.vlgmr.msra.gmra.mrb[4].mxu0 %v5485_v6  ;;  %2061 = vmatpush1.bf16.msra.mxu1 %v4860_v20  ;;  %v4881_v6 = vld [vmem:[#allocation2 + $0x3a0] ss:$24 sps:$4 sm:$0xff]  }
  0xf8   :  { %2143 = vmatpush1.bf16.msra.mxu0 %v4863_v21  ;;  %2062 = vmatprep.subr.bf16.mxu1 %v4868_v22  ;;  %v4953_v20 = vld [vmem:[#allocation2 + $0x5e0] ss:$24 sps:$4 sm:$0xff]   ;;  %v4958_v21 = vld [vmem:[#allocation2 + $0x614] ss:$24 sps:$4 sm:$0xff]   ;;  %v4956_v22 = vld [vmem:[#allocation2 + $0x610] ss:$24 sps:$4 sm:$0xff]  }
  0xf9   :  { %2144 = vmatprep.subr.bf16.mxu0 %v4871_v23  ;;  %2092 = vmatprep.mubr.bf16.mxu1 %v5499_v34  ;;  %v4961_v23 = vld [vmem:[#allocation2 + $0x644] ss:$24 sps:$4 sm:$0xff]  }
  0xfa   :  { %2174 = vmatprep.mubr.bf16.mxu0 %v5481_v51  ;;  %v4890_v51 = vld [vmem:[#allocation2 + $0x6f8] ss:$24 sps:$4 sm:$0xff]  }
  0xfb   :  { %2063 = vmatpush1.bf16.msra.mxu1 %v4866_v24  ;;  %v4959_v24 = vld [vmem:[#allocation2 + $0x640] ss:$24 sps:$4 sm:$0xff]  }
  0xfc   :  { %2145 = vmatpush1.bf16.msra.mxu0 %v4869_v25  ;;  %2064 = vmatprep.subr.bf16.mxu1 %v4874_v26  ;;  %v4964_v25 = vld [vmem:[#allocation2 + $0x674] ss:$24 sps:$4 sm:$0xff]   ;;  %v4962_v26 = vld [vmem:[#allocation2 + $0x670] ss:$24 sps:$4 sm:$0xff]  }
  0xfd   :  { %2146 = vmatprep.subr.bf16.mxu0 %v4877_v27  ;;  %v4967_v27 = vld [vmem:[#allocation2 + $0x6a4] ss:$24 sps:$4 sm:$0xff]  }
  0xff   :  { %2065 = vmatpush1.bf16.msra.mxu1 %v4872_v28  ;;  %v4965_v28 = vld [vmem:[#allocation2 + $0x6a0] ss:$24 sps:$4 sm:$0xff]  }
 0x100   :  { %2147 = vmatpush1.bf16.msra.mxu0 %v4875_v29  ;;  %2066 = vmatprep.subr.bf16.mxu1 %v4880_v30  ;;  %v4970_v29 = vld [vmem:[#allocation2 + $0x6d4] ss:$24 sps:$4 sm:$0xff]   ;;  %v4968_v30 = vld [vmem:[#allocation2 + $0x6d0] ss:$24 sps:$4 sm:$0xff]  }
 0x101   :  { %2148 = vmatprep.subr.bf16.mxu0 %v4883_v31  ;;  %v4973_v31 = vld [vmem:[#allocation2 + $0x704] ss:$24 sps:$4 sm:$0xff]  }
 0x103   :  { %2067 = vmatpush1.bf16.msra.mxu1 %v4878_v47  ;;  %v4976_v47 = vld [vmem:[#allocation2 + $0x734] ss:$24 sps:$4 sm:$0xff]  }
 0x104   :  { %2149 = vmatpush1.bf16.msra.mxu0 %v4881_v6  ;;  %2068 = vmatprep.subr.bf16.mxu1 %v4886_v32  ;;  %v4974_v32 = vld [vmem:[#allocation2 + $0x730] ss:$24 sps:$4 sm:$0xff]  }
 0x105   :  { %2150 = vmatprep.subr.bf16.mxu0 %v4889_v33 }
 0x107   :  { %2069 = vmatpush1.bf16.msra.mxu1 %v4884_v35  ;;  %v4979_v35 = vld [vmem:[#allocation2 + $0x764] ss:$24 sps:$4 sm:$0xff]  }
 0x108   :  { %2151 = vmatpush1.bf16.msra.mxu0 %v4887_v36  ;;  %2070 = vmatprep.subr.bf16.mxu1 %v4892_v37  ;;  %v4977_v37 = vld [vmem:[#allocation2 + $0x760] ss:$24 sps:$4 sm:$0xff]  }
 0x109   :  { %2152 = vmatprep.subr.bf16.mxu0 %v4895_v38  ;;  %v4982_v38 = vld [vmem:[#allocation2 + $0x794] ss:$24 sps:$4 sm:$0xff]  }
 0x10b   :  { %2071 = vmatpush1.bf16.msra.mxu1 %v4890_v51  ;;  %v4980_v51 = vld [vmem:[#allocation2 + $0x790] ss:$24 sps:$4 sm:$0xff]  }
 0x10c   :  { %2153 = vmatpush1.bf16.msra.mxu0 %v4893_v39  ;;  %2072 = vmatprep.subr.bf16.mxu1 %v4898_v40  ;;  %v4985_v39 = vld [vmem:[#allocation2 + $0x7c4] ss:$24 sps:$4 sm:$0xff]   ;;  %v4983_v40 = vld [vmem:[#allocation2 + $0x7c0] ss:$24 sps:$4 sm:$0xff]  }
 0x10d   :  { %2154 = vmatprep.subr.bf16.mxu0 %v4901_v41  ;;  %v4988_v41 = vld [vmem:[#allocation2 + $0x7f4] ss:$24 sps:$4 sm:$0xff]  }
 0x10f   :  { %2073 = vmatpush1.bf16.msra.mxu1 %v4896_v42  ;;  %v4986_v42 = vld [vmem:[#allocation2 + $0x7f0] ss:$24 sps:$4 sm:$0xff]  }
 0x110   :  { %2155 = vmatpush1.bf16.msra.mxu0 %v4899_v43  ;;  %2074 = vmatprep.subr.bf16.mxu1 %v4904_v44  ;;  %v4991_v43 = vld [vmem:[#allocation2 + $0x824] ss:$24 sps:$4 sm:$0xff]   ;;  %v4989_v44 = vld [vmem:[#allocation2 + $0x820] ss:$24 sps:$4 sm:$0xff]  }
 0x111   :  { %2156 = vmatprep.subr.bf16.mxu0 %v4907_v45  ;;  %v4994_v45 = vld [vmem:[#allocation2 + $0x854] ss:$24 sps:$4 sm:$0xff]  }
 0x113   :  { %2075 = vmatpush1.bf16.msra.mxu1 %v4902_v46  ;;  %v4992_v46 = vld [vmem:[#allocation2 + $0x850] ss:$24 sps:$4 sm:$0xff]  }
 0x114   :  { %2157 = vmatpush1.bf16.msra.mxu0 %v4905_v48  ;;  %2076 = vmatprep.subr.bf16.mxu1 %v4910_v49  ;;  %v4997_v48 = vld [vmem:[#allocation2 + $0x884] ss:$24 sps:$4 sm:$0xff]   ;;  %v4995_v49 = vld [vmem:[#allocation2 + $0x880] ss:$24 sps:$4 sm:$0xff]  }
 0x115   :  { %2158 = vmatprep.subr.bf16.mxu0 %v4913_v50  ;;  %v5000_v50 = vld [vmem:[#allocation2 + $0x8b4] ss:$24 sps:$4 sm:$0xff]  }
 0x117   :  { %2077 = vmatpush1.bf16.msra.mxu1 %v4908_v52  ;;  %v4998_v52 = vld [vmem:[#allocation2 + $0x8b0] ss:$24 sps:$4 sm:$0xff]  }
 0x118   :  { %2159 = vmatpush1.bf16.msra.mxu0 %v4911_v53  ;;  %2078 = vmatprep.subr.bf16.mxu1 %v4916_v54  ;;  %v5003_v53 = vld [vmem:[#allocation2 + $0x8e4] ss:$24 sps:$4 sm:$0xff]   ;;  %v5001_v54 = vld [vmem:[#allocation2 + $0x8e0] ss:$24 sps:$4 sm:$0xff]  }
 0x119   :  { %2160 = vmatprep.subr.bf16.mxu0 %v4919_v55  ;;  %v364_v55 = vlaneseq }
 0x11b   :  { %2079 = vmatpush1.bf16.msra.mxu1 %v4914_v56  ;;  %v5519_v56 = vshrl.u32 %v364_v55, 7 }
 0x11c   :  { %2161 = vmatpush1.bf16.msra.mxu0 %v4917_v57  ;;  %2080 = vmatprep.subr.bf16.mxu1 %v4922_v58  ;;  %v362_v58 = vld [vmem:[%s6371_s2] sm:$0x3f]  ;;  %s5372_s2 = scalar_lea.hbm %s6378_s9, 16 }
 0x11d   :  { %2162 = vmatprep.subr.bf16.mxu0 %v4925_v59  ;;  %v5522_v57 = vsub.s32 0, %v5519_v56  ;;  %v5528_v59 = vsub.s32 1, %v5519_v56  ;;  %p5373_p7 = scmp.ne.s32.totalorder %s6378_s9, %s5372_s2  ;;  %p5376_p8 = scmp.lt.u32.totalorder %s5372_s2, %s6378_s9 }
 0x11f   :  { %2081 = vmatpush1.bf16.msra.mxu1 %v4920_v60  ;;  %v367_v60 = vrot.slane %v362_v58, %v5522_v57  ;;  %p5378_p9 = pnand %p5376_p8, %p5373_p7 }
 0x120   :  { %2163 = vmatpush1.bf16.msra.mxu0 %v4923_v61  ;;  %2082 = vmatprep.subr.bf16.mxu1 %v4928_v62  ;;  %v371_v61 = vrot.slane %v362_v58, %v5528_v59 }
 0x121   :  { %2164 = vmatprep.subr.bf16.mxu0 %v4931_v63 }
 0x123   :  { %2083 = vmatpush1.bf16.msra.mxu1 %v4926_v0 }
 0x124   :  { %2165 = vmatpush1.bf16.msra.mxu0 %v4929_v1  ;;  %2084 = vmatprep.subr.bf16.mxu1 %v4934_v2 }
 0x125   :  { %2166 = vmatprep.subr.bf16.mxu0 %v4937_v3 }
 0x127   :  { %2085 = vmatpush1.bf16.msra.mxu1 %v4932_v4 }
 0x128   :  { %2167 = vmatpush1.bf16.msra.mxu0 %v4935_v5  ;;  %2086 = vmatprep.subr.bf16.mxu1 %v4940_v8 }
 0x129   :  { %2168 = vmatprep.subr.bf16.mxu0 %v4943_v9 }
 0x12b   :  { %2087 = vmatpush1.bf16.msra.mxu1 %v4938_v10 }
 0x12c   :  { %2169 = vmatpush1.bf16.msra.mxu0 %v4941_v11  ;;  %2088 = vmatprep.subr.bf16.mxu1 %v4946_v12  ;;  %v5533_v11 = vsub.s32 2, %v5519_v56 }
 0x12d   :  { %2170 = vmatprep.subr.bf16.mxu0 %v4949_v13  ;;  %v5537_v13 = vsub.s32 3, %v5519_v56 }
 0x12e   :  { %v375_v12 = vrot.slane %v362_v58, %v5533_v11 }
 0x12f   :  { %2089 = vmatpush1.bf16.msra.mxu1 %v4944_v15 }
 0x130   :  { %2171 = vmatpush1.bf16.msra.mxu0 %v4947_v16  ;;  %2090 = vmatprep.subr.bf16.mxu1 %v4952_v17  ;;  %v379_v16 = vrot.slane %v362_v58, %v5537_v13 }
 0x131   :  { %2172 = vmatprep.subr.bf16.mxu0 %v4955_v18 }
 0x133   :  { %2091 = vmatpush1.bf16.msra.mxu1 %v4950_v19 }
 0x134   :  { %2173 = vmatpush1.bf16.msra.mxu0 %v4953_v20 }
 0x135   :  { %2183 = vmatprep.subr.bf16.mxu0 %v4958_v21 }
 0x136   :  { %2093 = vmatmul.mubr.bf16.vlgmr.msra.gmra.mrb[4].mxu1 %v5504_v14 }
 0x137   :  { %2175 = vmatmul.mubr.bf16.vlgmr.msra.gmra.mrb[4].mxu0 %v5487_v7  ;;  %v4971_v7 = vld [vmem:[#allocation2 + $0x700] ss:$24 sps:$4 sm:$0xff]  }
 0x138   :  { %2184 = vmatpush1.bf16.msra.mxu0 %v4956_v22  ;;  %2215 = vmatprep.mubr.bf16.mxu0 %v5499_v34  ;;  %v5541_v22 = vsub.s32 4, %v5519_v56 }
 0x139   :  { %2185 = vmatprep.subr.bf16.mxu0 %v4961_v23  ;;  %v5544_v23 = vsub.s32 5, %v5519_v56 }
 0x13c   :  { %2186 = vmatpush1.bf16.msra.mxu0 %v4959_v24  ;;  %v383_v24 = vrot.slane %v362_v58, %v5541_v22 }
 0x13d   :  { %2187 = vmatprep.subr.bf16.mxu0 %v4964_v25  ;;  %v387_v25 = vrot.slane %v362_v58, %v5544_v23 }
 0x140   :  { %2188 = vmatpush1.bf16.msra.mxu0 %v4962_v26 }
 0x141   :  { %2189 = vmatprep.subr.bf16.mxu0 %v4967_v27 }
 0x144   :  { %2190 = vmatpush1.bf16.msra.mxu0 %v4965_v28 }
 0x145   :  { %2191 = vmatprep.subr.bf16.mxu0 %v4970_v29 }
 0x148   :  { %2192 = vmatpush1.bf16.msra.mxu0 %v4968_v30 }
 0x149   :  { %2193 = vmatprep.subr.bf16.mxu0 %v4973_v31  ;;  %v1889_v6 = vpop.f32.mrb[0].mxu1 }
 0x14a   :  { %v1891_v34 = vpop.f32.mrb[1].mxu1  ;;  %v1890_v62 = vadd.f32 %v1889_v6, %v367_v60 }
 0x14b   :  { %v1893_v33 = vpop.f32.mrb[2].mxu1 }
 0x14c   :  { %2194 = vmatpush1.bf16.msra.mxu0 %v4971_v7  ;;  %v1894_v36 = vpop.f32.mrb[3].mxu1 }
 0x14d   :  { %2195 = vmatprep.subr.bf16.mxu0 %v4976_v47 }
 0x150   :  { %2196 = vmatpush1.bf16.msra.mxu0 %v4974_v32 }
 0x151   :  { %2197 = vmatprep.subr.bf16.mxu0 %v4979_v35 }
 0x154   :  { %2198 = vmatpush1.bf16.msra.mxu0 %v4977_v37 }
 0x155   :  { %2199 = vmatprep.subr.bf16.mxu0 %v4982_v38 }
 0x158   :  { %2200 = vmatpush1.bf16.msra.mxu0 %v4980_v51 }
 0x159   :  { %2201 = vmatprep.subr.bf16.mxu0 %v4985_v39 }
 0x15c   :  { %2202 = vmatpush1.bf16.msra.mxu0 %v4983_v40 }
 0x15d   :  { %2203 = vmatprep.subr.bf16.mxu0 %v4988_v41 }
 0x160   :  { %2204 = vmatpush1.bf16.msra.mxu0 %v4986_v42 }
 0x161   :  { %2205 = vmatprep.subr.bf16.mxu0 %v4991_v43 }
 0x164   :  { %2206 = vmatpush1.bf16.msra.mxu0 %v4989_v44 }
 0x165   :  { %2207 = vmatprep.subr.bf16.mxu0 %v4994_v45 }
 0x168   :  { %2208 = vmatpush1.bf16.msra.mxu0 %v4992_v46 }
 0x169   :  { %2209 = vmatprep.subr.bf16.mxu0 %v4997_v48 }
 0x16c   :  { %2210 = vmatpush1.bf16.msra.mxu0 %v4995_v49 }
 0x16d   :  { %2211 = vmatprep.subr.bf16.mxu0 %v5000_v50 }
 0x170   :  { %2212 = vmatpush1.bf16.msra.mxu0 %v4998_v52 }
 0x171   :  { %2213 = vmatprep.subr.bf16.mxu0 %v5003_v53 }
 0x174   :  { %2214 = vmatpush1.bf16.msra.mxu0 %v5001_v54 }
 0x177   :  { %2216 = vmatmul.mubr.bf16.vlgmr.msra.gmra.mrb[4].mxu0 %v5504_v14  ;;  %v1892_v14 = vadd.f32 %v1891_v34, %v371_v61 }
 0x18a   :  { %v1971_v63 = vpop.f32.mrb[0].mxu0 }
 0x18b   :  { %v4503_v0 = vadd.f32 %v1971_v63, %v1890_v62  ;;  %v1973_v1 = vpop.f32.mrb[1].mxu0 }
 0x18c   :  { %v4505_v2 = vadd.f32 %v1973_v1, %v1892_v14  ;;  %v1975_v3 = vpop.f32.mrb[2].mxu0  ;;  %v5006_v1 = vld [vmem:[%s6374_s5 + $0x4] ss:$16 sps:$4 sm:$0xff]  }
 0x18d   :  { %v1976_v4 = vpop.f32.mrb[3].mxu0  ;;  %v2230_v17 = vmul.f32 0.70710677, %v4503_v0  ;;  %v2224_v36 = vmul.f32 0.5, %v4503_v0  ;;  %v5004_v0 = vld [vmem:[%s6374_s5] ss:$16 sps:$4 sm:$0xff]   ;;  %3547 = vmatprep.subr.bf16.mxu1 %v5006_v1 }
 0x18e   :  { %v2231_v18 = vmul.f32 0.70710677, %v4505_v2  ;;  %v2225_v37 = vmul.f32 0.5, %v4505_v2  ;;  %v5007_v2 = vld [vmem:[%s6374_s5 + $0x8] ss:$16 sps:$4 sm:$0xff]   ;;  %3548 = vmatpush1.bf16.msra.mxu1 %v5004_v0 }
 0x18f   :  { %5292 = verf.f32 %v2230_v17  ;;  %v5009_v3 = vld [vmem:[%s6374_s5 + $0xc] ss:$16 sps:$4 sm:$0xff]   ;;  %v5012_v4 = vld [vmem:[%s6374_s5 + $0x24] ss:$16 sps:$4 sm:$0xff]  }
 0x190   :  { %5294 = verf.f32 %v2231_v18  ;;  %3670 = vmatprep.subr.bf16.mxu0 %v5009_v3  ;;  %3549 = vmatprep.subr.bf16.mxu1 %v5012_v4  ;;  %v5024_v17 = vld [vmem:[%s6374_s5 + $0x64] ss:$16 sps:$4 sm:$0xff]   ;;  %v5027_v18 = vld [vmem:[%s6374_s5 + $0x6c] ss:$16 sps:$4 sm:$0xff]  }
 0x191   :  { %3671 = vmatpush1.bf16.msra.mxu0 %v5007_v2 }
 0x199   :  { %v5293_v26 = vpop.eup %5292 }
 0x19a   :  { %v5295_v28 = vpop.eup %5294  ;;  %v2242_v32 = vadd.f32 1.0, %v5293_v26  ;;  %v5031_v26 = vld [vmem:[%s6374_s5 + $0x88] ss:$16 sps:$4 sm:$0xff]  }
 0x19b   :  { %v2243_v33 = vadd.f32 1.0, %v5295_v28  ;;  %v5039_v28 = vld [vmem:[%s6374_s5 + $0xac] ss:$16 sps:$4 sm:$0xff]  }
 0x19c   :  { %v5548_v39 = vmul.f32 %v2242_v32, %v2224_v36  ;;  %v5051_v32 = vld [vmem:[%s6374_s5 + $0xec] ss:$16 sps:$4 sm:$0xff]   ;;  %v5054_v36 = vld [vmem:[%s6374_s5 + $0x104] ss:$16 sps:$4 sm:$0xff]  }
 0x19d   :  { %v5550_v40 = vmul.f32 %v2243_v33, %v2225_v37  ;;  %v5046_v33 = vld [vmem:[%s6374_s5 + $0xe0] ss:$16 sps:$4 sm:$0xff]   ;;  %v5057_v37 = vld [vmem:[%s6374_s5 + $0x10c] ss:$16 sps:$4 sm:$0xff]  }
 0x19f   :  { %v2254_v44 = vadd.f32 %v5550_v40, %v5548_v39 }
 0x209   :  { %v2094_v5 = vpop.f32.mrb[4].mxu1 }
 0x20a   :  { %v2096_v8 = vpop.f32.mrb[5].mxu1  ;;  %v4506_v15 = vadd.f32 %v2094_v5, %v375_v12  ;;  %v5015_v5 = vld [vmem:[%s6374_s5 + $0x2c] ss:$16 sps:$4 sm:$0xff]  }
 0x20b   :  { %v2098_v9 = vpop.f32.mrb[6].mxu1  ;;  %v4507_v20 = vadd.f32 %v2096_v8, %v379_v16  ;;  %v5010_v8 = vld [vmem:[%s6374_s5 + $0x20] ss:$16 sps:$4 sm:$0xff]   ;;  %3672 = vmatprep.subr.bf16.mxu0 %v5015_v5  ;;  %v5021_v12 = vld [vmem:[%s6374_s5 + $0x4c] ss:$16 sps:$4 sm:$0xff]  }
 0x20c   :  { %v2099_v10 = vpop.f32.mrb[7].mxu1  ;;  %v2232_v19 = vmul.f32 0.70710677, %v4506_v15  ;;  %v2226_v41 = vmul.f32 0.5, %v4506_v15  ;;  %v5013_v9 = vld [vmem:[%s6374_s5 + $0x28] ss:$16 sps:$4 sm:$0xff]   ;;  %3550 = vmatpush1.bf16.msra.mxu1 %v5010_v8 }
 0x20d   :  { %v2233_v21 = vmul.f32 0.70710677, %v4507_v20  ;;  %v2227_v45 = vmul.f32 0.5, %v4507_v20  ;;  %v5018_v10 = vld [vmem:[%s6374_s5 + $0x44] ss:$16 sps:$4 sm:$0xff]   ;;  %3673 = vmatpush1.bf16.msra.mxu0 %v5013_v9 }
 0x20e   :  { %5296 = verf.f32 %v2232_v19  ;;  %v5016_v15 = vld [vmem:[%s6374_s5 + $0x40] ss:$16 sps:$4 sm:$0xff]   ;;  %3551 = vmatprep.subr.bf16.mxu1 %v5018_v10  ;;  %v5019_v16 = vld [vmem:[%s6374_s5 + $0x48] ss:$16 sps:$4 sm:$0xff]   ;;  %3674 = vmatprep.subr.bf16.mxu0 %v5021_v12  ;;  %v5072_v10 = vld [vmem:[%s6374_s5 + $0x164] ss:$16 sps:$4 sm:$0xff]  }
 0x20f   :  { %5298 = verf.f32 %v2233_v21  ;;  %v5022_v19 = vld [vmem:[%s6374_s5 + $0x60] ss:$16 sps:$4 sm:$0xff]   ;;  %v5025_v20 = vld [vmem:[%s6374_s5 + $0x68] ss:$16 sps:$4 sm:$0xff]   ;;  %v5030_v21 = vld [vmem:[%s6374_s5 + $0x84] ss:$16 sps:$4 sm:$0xff]  }
 0x210   :  { %3552 = vmatpush1.bf16.msra.mxu1 %v5016_v15  ;;  %v5070_v12 = vld [vmem:[%s6374_s5 + $0x160] ss:$16 sps:$4 sm:$0xff]   ;;  %v5073_v15 = vld [vmem:[%s6374_s5 + $0x168] ss:$16 sps:$4 sm:$0xff]  }
 0x211   :  { %3675 = vmatpush1.bf16.msra.mxu0 %v5019_v16  ;;  %3553 = vmatprep.subr.bf16.mxu1 %v5024_v17  ;;  %v5078_v16 = vld [vmem:[%s6374_s5 + $0x184] ss:$16 sps:$4 sm:$0xff]   ;;  %v5076_v17 = vld [vmem:[%s6374_s5 + $0x180] ss:$16 sps:$4 sm:$0xff]  }
 0x212   :  { %3676 = vmatprep.subr.bf16.mxu0 %v5027_v18  ;;  %v5079_v18 = vld [vmem:[%s6374_s5 + $0x188] ss:$16 sps:$4 sm:$0xff]  }
 0x214   :  { %3554 = vmatpush1.bf16.msra.mxu1 %v5022_v19  ;;  %v5081_v19 = vld [vmem:[%s6374_s5 + $0x18c] ss:$16 sps:$4 sm:$0xff]  }
 0x215   :  { %3677 = vmatpush1.bf16.msra.mxu0 %v5025_v20  ;;  %3555 = vmatprep.subr.bf16.mxu1 %v5030_v21  ;;  %v5084_v20 = vld [vmem:[%s6374_s5 + $0x1a4] ss:$16 sps:$4 sm:$0xff]   ;;  %v5087_v21 = vld [vmem:[%s6374_s5 + $0x1ac] ss:$16 sps:$4 sm:$0xff]  }
 0x218   :  { %v5297_v47 = vpop.eup %5296 }
 0x219   :  { %v2244_v38 = vadd.f32 1.0, %v5297_v47  ;;  %v5299_v51 = vpop.eup %5298  ;;  %v5040_v47 = vld [vmem:[%s6374_s5 + $0xc0] ss:$16 sps:$4 sm:$0xff]  }
 0x21a   :  { %v2245_v43 = vadd.f32 1.0, %v5299_v51  ;;  %v5055_v51 = vld [vmem:[%s6374_s5 + $0x108] ss:$16 sps:$4 sm:$0xff]  }
 0x21b   :  { %v5552_v42 = vmul.f32 %v2244_v38, %v2226_v41  ;;  %v5052_v38 = vld [vmem:[%s6374_s5 + $0x100] ss:$16 sps:$4 sm:$0xff]   ;;  %v5060_v41 = vld [vmem:[%s6374_s5 + $0x124] ss:$16 sps:$4 sm:$0xff]  }
 0x21c   :  { %v5556_v46 = vmul.f32 %v2245_v43, %v2227_v45  ;;  %v5063_v43 = vld [vmem:[%s6374_s5 + $0x12c] ss:$16 sps:$4 sm:$0xff]   ;;  %v5061_v45 = vld [vmem:[%s6374_s5 + $0x128] ss:$16 sps:$4 sm:$0xff]  }
 0x21d   :  { %v2255_v48 = vadd.f32 %v2254_v44, %v5552_v42  ;;  %v5058_v44 = vld [vmem:[%s6374_s5 + $0x120] ss:$16 sps:$4 sm:$0xff]  }
 0x21f   :  { %v2256_v61 = vadd.f32 %v2255_v48, %v5556_v46  ;;  %v5066_v48 = vld [vmem:[%s6374_s5 + $0x144] ss:$16 sps:$4 sm:$0xff]  }
 0x24a   :  { %v2217_v27 = vpop.f32.mrb[4].mxu0 }
 0x24b   :  { %v4508_v29 = vadd.f32 %v2217_v27, %v383_v24  ;;  %v2219_v30 = vpop.f32.mrb[5].mxu0  ;;  %v5033_v24 = vld [vmem:[%s6374_s5 + $0x8c] ss:$16 sps:$4 sm:$0xff]   ;;  %v5036_v27 = vld [vmem:[%s6374_s5 + $0xa4] ss:$16 sps:$4 sm:$0xff]  }
 0x24c   :  { %v4509_v31 = vadd.f32 %v2219_v30, %v387_v25  ;;  %v2221_v7 = vpop.f32.mrb[6].mxu0  ;;  %v5028_v25 = vld [vmem:[%s6374_s5 + $0x80] ss:$16 sps:$4 sm:$0xff]   ;;  %3678 = vmatprep.subr.bf16.mxu0 %v5033_v24  ;;  %v5037_v30 = vld [vmem:[%s6374_s5 + $0xa8] ss:$16 sps:$4 sm:$0xff]  }
 0x24d   :  { %v2234_v6 = vmul.f32 0.70710677, %v4508_v29  ;;  %v2222_v34 = vpop.f32.mrb[7].mxu0  ;;  %v2228_v52 = vmul.f32 0.5, %v4508_v29  ;;  %3556 = vmatpush1.bf16.msra.mxu1 %v5028_v25  ;;  %v5034_v29 = vld [vmem:[%s6374_s5 + $0xa0] ss:$16 sps:$4 sm:$0xff]   ;;  %3679 = vmatpush1.bf16.msra.mxu0 %v5031_v26 }
 0x24e   :  { %v2235_v35 = vmul.f32 0.70710677, %v4509_v31  ;;  %v2229_v54 = vmul.f32 0.5, %v4509_v31  ;;  %3557 = vmatprep.subr.bf16.mxu1 %v5036_v27  ;;  %v5042_v31 = vld [vmem:[%s6374_s5 + $0xc4] ss:$16 sps:$4 sm:$0xff]   ;;  %3680 = vmatprep.subr.bf16.mxu0 %v5039_v28 }
 0x24f   :  { %5300 = verf.f32 %v2234_v6  ;;  %v5045_v7 = vld [vmem:[%s6374_s5 + $0xcc] ss:$16 sps:$4 sm:$0xff]   ;;  %v5043_v6 = vld [vmem:[%s6374_s5 + $0xc8] ss:$16 sps:$4 sm:$0xff]   ;;  %v5048_v34 = vld [vmem:[%s6374_s5 + $0xe4] ss:$16 sps:$4 sm:$0xff]  }
 0x250   :  { %5302 = verf.f32 %v2235_v35  ;;  %v5049_v35 = vld [vmem:[%s6374_s5 + $0xe8] ss:$16 sps:$4 sm:$0xff]   ;;  %v5082_v24 = vld [vmem:[%s6374_s5 + $0x1a0] ss:$16 sps:$4 sm:$0xff]   ;;  %v5090_v26 = vld [vmem:[%s6374_s5 + $0x1c4] ss:$16 sps:$4 sm:$0xff]  }
 0x251   :  { %3558 = vmatpush1.bf16.msra.mxu1 %v5034_v29  ;;  %3681 = vmatpush1.bf16.msra.mxu0 %v5037_v30  ;;  %v5085_v25 = vld [vmem:[%s6374_s5 + $0x1a8] ss:$16 sps:$4 sm:$0xff]   ;;  %v5093_v27 = vld [vmem:[%s6374_s5 + $0x1cc] ss:$16 sps:$4 sm:$0xff]   ;;  %v5088_v28 = vld [vmem:[%s6374_s5 + $0x1c0] ss:$16 sps:$4 sm:$0xff]  }
 0x252   :  { %3559 = vmatprep.subr.bf16.mxu1 %v5042_v31  ;;  %3682 = vmatprep.subr.bf16.mxu0 %v5045_v7  ;;  %v5091_v29 = vld [vmem:[%s6374_s5 + $0x1c8] ss:$16 sps:$4 sm:$0xff]   ;;  %v5096_v30 = vld [vmem:[%s6374_s5 + $0x1e4] ss:$16 sps:$4 sm:$0xff]   ;;  %v5099_v31 = vld [vmem:[%s6374_s5 + $0x1ec] ss:$16 sps:$4 sm:$0xff]  }
 0x253   :  { %v5094_v7 = vld [vmem:[%s6374_s5 + $0x1e0] ss:$16 sps:$4 sm:$0xff]  }
 0x255   :  { %3560 = vmatpush1.bf16.msra.mxu1 %v5040_v47  ;;  %3683 = vmatpush1.bf16.msra.mxu0 %v5043_v6  ;;  %v5097_v47 = vld [vmem:[%s6374_s5 + $0x1e8] ss:$16 sps:$4 sm:$0xff]   ;;  %v5102_v6 = vld [vmem:[%s6374_s5 + $0x204] ss:$16 sps:$4 sm:$0xff]  }
 0x256   :  { %3561 = vmatprep.subr.bf16.mxu1 %v5048_v34  ;;  %3684 = vmatprep.subr.bf16.mxu0 %v5051_v32  ;;  %v5105_v34 = vld [vmem:[%s6374_s5 + $0x20c] ss:$16 sps:$4 sm:$0xff]  }
 0x259   :  { %v5301_v49 = vpop.eup %5300  ;;  %3562 = vmatpush1.bf16.msra.mxu1 %v5046_v33  ;;  %3685 = vmatpush1.bf16.msra.mxu0 %v5049_v35 }
 0x25a   :  { %v5303_v50 = vpop.eup %5302  ;;  %v2246_v53 = vadd.f32 1.0, %v5301_v49  ;;  %3563 = vmatprep.subr.bf16.mxu1 %v5054_v36  ;;  %3686 = vmatprep.subr.bf16.mxu0 %v5057_v37  ;;  %v5069_v49 = vld [vmem:[%s6374_s5 + $0x14c] ss:$16 sps:$4 sm:$0xff]   ;;  %v2291_v36 = vld [vmem:[%s6372_s3] sm:$0x3f]  ;;  %s4499_s3 = sld [smem:[#allocation8 + $0x1]] }
 0x25b   :  { %v2247_v58 = vadd.f32 1.0, %v5303_v50  ;;  %v5064_v50 = vld [vmem:[%s6374_s5 + $0x140] ss:$16 sps:$4 sm:$0xff]  }
 0x25c   :  { %v5559_v60 = vmul.f32 %v2246_v53, %v2228_v52  ;;  %v5067_v52 = vld [vmem:[%s6374_s5 + $0x148] ss:$16 sps:$4 sm:$0xff]   ;;  %v2329_v37 = vld [vmem:[%s6373_s4] sm:$0x3f]  ;;  %s3842_s4 = sld [smem:[#allocation8]] }
 0x25d   :  { %v5562_v62 = vmul.f32 %v2247_v58, %v2229_v54  ;;  %3564 = vmatpush1.bf16.msra.mxu1 %v5052_v38  ;;  %3687 = vmatpush1.bf16.msra.mxu0 %v5055_v51  ;;  %v2312_v38 = vrot.slane %v2291_v36, %v5541_v22  ;;  %v2300_v51 = vrot.slane %v2291_v36, %v5528_v59 }
 0x25e   :  { %v2257_v14 = vadd.f32 %v2256_v61, %v5559_v60  ;;  %3565 = vmatprep.subr.bf16.mxu1 %v5060_v41  ;;  %3688 = vmatprep.subr.bf16.mxu0 %v5063_v43  ;;  %v2296_v41 = vrot.slane %v2291_v36, %v5522_v57  ;;  %v2308_v43 = vrot.slane %v2291_v36, %v5537_v13 }
 0x260   :  { %v2258_v63 = vadd.f32 %v2257_v14, %v5562_v62 }
 0x261   :  { %3566 = vmatpush1.bf16.msra.mxu1 %v5058_v44  ;;  %3689 = vmatpush1.bf16.msra.mxu0 %v5061_v45  ;;  %v2304_v44 = vrot.slane %v2291_v36, %v5533_v11  ;;  %v2316_v45 = vrot.slane %v2291_v36, %v5544_v23  ;;  %v5138_v36 = vld [vmem:[%s6374_s5 + $0x2c4] ss:$16 sps:$4 sm:$0xff]  }
 0x262   :  { %2259 = vadd.xlane.f32.xlu0 %v2258_v63  ;;  %3567 = vmatprep.subr.bf16.mxu1 %v5066_v48 }
 0x263   :  { %3690 = vmatprep.subr.bf16.mxu0 %v5069_v49  ;;  %v2338_v49 = vrot.slane %v2329_v37, %v5528_v59 }
 0x265   :  { %3568 = vmatpush1.bf16.msra.mxu1 %v5064_v50  ;;  %3691 = vmatpush1.bf16.msra.mxu0 %v5067_v52  ;;  %v2334_v50 = vrot.slane %v2329_v37, %v5522_v57  ;;  %v2346_v52 = vrot.slane %v2329_v37, %v5537_v13 }
 0x266   :  { %3569 = vmatprep.subr.bf16.mxu1 %v5072_v10 }
 0x269   :  { %3570 = vmatpush1.bf16.msra.mxu1 %v5070_v12 }
 0x26a   :  { %3571 = vmatprep.subr.bf16.mxu1 %v5078_v16  ;;  %v5108_v16 = vld [vmem:[%s6374_s5 + $0x224] ss:$16 sps:$4 sm:$0xff]  }
 0x26d   :  { %3572 = vmatpush1.bf16.msra.mxu1 %v5076_v17  ;;  %v5111_v17 = vld [vmem:[%s6374_s5 + $0x22c] ss:$16 sps:$4 sm:$0xff]  }
 0x26e   :  { %3573 = vmatprep.subr.bf16.mxu1 %v5084_v20  ;;  %v5109_v20 = vld [vmem:[%s6374_s5 + $0x228] ss:$16 sps:$4 sm:$0xff]  }
 0x271   :  { %3574 = vmatpush1.bf16.msra.mxu1 %v5082_v24  ;;  %v5117_v24 = vld [vmem:[%s6374_s5 + $0x24c] ss:$16 sps:$4 sm:$0xff]  }
 0x272   :  { %3575 = vmatprep.subr.bf16.mxu1 %v5090_v26  ;;  %v5115_v26 = vld [vmem:[%s6374_s5 + $0x248] ss:$16 sps:$4 sm:$0xff]  }
 0x275   :  { %3576 = vmatpush1.bf16.msra.mxu1 %v5088_v28  ;;  %v5123_v28 = vld [vmem:[%s6374_s5 + $0x26c] ss:$16 sps:$4 sm:$0xff]  }
 0x276   :  { %3577 = vmatprep.subr.bf16.mxu1 %v5096_v30  ;;  %v5121_v30 = vld [vmem:[%s6374_s5 + $0x268] ss:$16 sps:$4 sm:$0xff]  }
 0x279   :  { %3578 = vmatpush1.bf16.msra.mxu1 %v5094_v7  ;;  %v5129_v7 = vld [vmem:[%s6374_s5 + $0x28c] ss:$16 sps:$4 sm:$0xff]  }
 0x27a   :  { %3588 = vmatprep.subr.bf16.mxu1 %v5102_v6  ;;  %v5127_v6 = vld [vmem:[%s6374_s5 + $0x288] ss:$16 sps:$4 sm:$0xff]  }
 0x2ef   :  { %v2260_v53 = vpop.xlane.xlu0 %2259 }
 0x2f0   :  { %v2262_v54 = vmul.f32 0.0013020834, %v2260_v53  ;;  %v2342_v53 = vrot.slane %v2329_v37, %v5533_v11 }
 0x2f2   :  { %v5699_v58 = vsub.f32 %v5548_v39, %v2262_v54  ;;  %v5702_v61 = vsub.f32 %v5550_v40, %v2262_v54  ;;  %v5705_v14 = vsub.f32 %v5552_v42, %v2262_v54  ;;  %v5708_v63 = vsub.f32 %v5556_v46, %v2262_v54 }
 0x2f3   :  { %v5715_v2 = vsub.f32 %v5559_v60, %v2262_v54  ;;  %v5720_v3 = vsub.f32 %v5562_v62, %v2262_v54  ;;  %v5075_v62 = vld [vmem:[%s6374_s5 + $0x16c] ss:$16 sps:$4 sm:$0xff]  }
 0x2f4   :  { %v2269_v0 = vmul.f32 %v5699_v58, %v5699_v58  ;;  %v2270_v1 = vmul.f32 %v5702_v61, %v5702_v61  ;;  %v2271_v39 = vmul.f32 %v5705_v14, %v5705_v14  ;;  %v2272_v42 = vmul.f32 %v5708_v63, %v5708_v63  ;;  %3692 = vmatprep.subr.bf16.mxu0 %v5075_v62 }
 0x2f5   :  { %v2273_v4 = vmul.f32 %v5715_v2, %v5715_v2  ;;  %v2274_v8 = vmul.f32 %v5720_v3, %v5720_v3  ;;  %3693 = vmatpush1.bf16.msra.mxu0 %v5073_v15 }
 0x2f6   :  { %v2275_v40 = vadd.f32 %v2270_v1, %v2269_v0  ;;  %3694 = vmatprep.subr.bf16.mxu0 %v5081_v19  ;;  %v5106_v19 = vld [vmem:[%s6374_s5 + $0x220] ss:$16 sps:$4 sm:$0xff]  }
 0x2f8   :  { %v2276_v46 = vadd.f32 %v2275_v40, %v2271_v39 }
 0x2f9   :  { %3695 = vmatpush1.bf16.msra.mxu0 %v5079_v18 }
 0x2fa   :  { %v2277_v5 = vadd.f32 %v2276_v46, %v2272_v42  ;;  %3696 = vmatprep.subr.bf16.mxu0 %v5087_v21  ;;  %v2354_v42 = vrot.slane %v2329_v37, %v5544_v23  ;;  %v5114_v21 = vld [vmem:[%s6374_s5 + $0x244] ss:$16 sps:$4 sm:$0xff]  }
 0x2fc   :  { %v2278_v60 = vadd.f32 %v2277_v5, %v2273_v4  ;;  %v2350_v4 = vrot.slane %v2329_v37, %v5541_v22  ;;  %v5100_v22 = vld [vmem:[%s6374_s5 + $0x200] ss:$16 sps:$4 sm:$0xff]   ;;  %v5141_v37 = vld [vmem:[%s6374_s5 + $0x2cc] ss:$16 sps:$4 sm:$0xff]  }
 0x2fd   :  { %3697 = vmatpush1.bf16.msra.mxu0 %v5085_v25  ;;  %v5112_v25 = vld [vmem:[%s6374_s5 + $0x240] ss:$16 sps:$4 sm:$0xff]  }
 0x2fe   :  { %v2279_v9 = vadd.f32 %v2278_v60, %v2274_v8  ;;  %3698 = vmatprep.subr.bf16.mxu0 %v5093_v27  ;;  %v5120_v27 = vld [vmem:[%s6374_s5 + $0x264] ss:$16 sps:$4 sm:$0xff]  }
 0x300   :  { %2280 = vadd.xlane.f32.xlu0 %v2279_v9 }
 0x301   :  { %3699 = vmatpush1.bf16.msra.mxu0 %v5091_v29  ;;  %v5118_v29 = vld [vmem:[%s6374_s5 + $0x260] ss:$16 sps:$4 sm:$0xff]  }
 0x302   :  { %3700 = vmatprep.subr.bf16.mxu0 %v5099_v31  ;;  %v5126_v31 = vld [vmem:[%s6374_s5 + $0x284] ss:$16 sps:$4 sm:$0xff]  }
 0x305   :  { %3701 = vmatpush1.bf16.msra.mxu0 %v5097_v47  ;;  %v5124_v47 = vld [vmem:[%s6374_s5 + $0x280] ss:$16 sps:$4 sm:$0xff]  }
 0x306   :  { %3711 = vmatprep.subr.bf16.mxu0 %v5105_v34  ;;  %v5132_v34 = vld [vmem:[%s6374_s5 + $0x2a4] ss:$16 sps:$4 sm:$0xff]  }
 0x38d   :  { %v2281_v32 = vpop.xlane.xlu0 %2280 }
 0x38e   :  { %v2282_v33 = vmul.f32 0.0013020834, %v2281_v32  ;;  %v5135_v32 = vld [vmem:[%s6374_s5 + $0x2ac] ss:$16 sps:$4 sm:$0xff]  }
 0x390   :  { %v2283_v35 = vadd.f32 1e-05, %v2282_v33  ;;  %v5130_v33 = vld [vmem:[%s6374_s5 + $0x2a0] ss:$16 sps:$4 sm:$0xff]  }
 0x392   :  { %5304 = vrsqrt.f32 %v2283_v35  ;;  %v5133_v35 = vld [vmem:[%s6374_s5 + $0x2a8] ss:$16 sps:$4 sm:$0xff]  }
 0x39c   :  { %v5305_v48 = vpop.eup %5304 }
 0x39d   :  { %v2286_v54 = vmul.f32 %v5305_v48, %v5702_v61  ;;  %v2285_v0 = vmul.f32 %v5305_v48, %v5699_v58  ;;  %v2288_v1 = vmul.f32 %v5305_v48, %v5708_v63  ;;  %v2287_v39 = vmul.f32 %v5305_v48, %v5705_v14 }
 0x39e   :  { %v2290_v40 = vmul.f32 %v5305_v48, %v5720_v3  ;;  %v2289_v46 = vmul.f32 %v5305_v48, %v5715_v2  ;;  %v5103_v2 = vld [vmem:[%s6374_s5 + $0x208] ss:$16 sps:$4 sm:$0xff]   ;;  %v5150_v48 = vld [vmem:[%s6374_s5 + $0x304] ss:$16 sps:$4 sm:$0xff]  }
 0x39f   :  { %v2324_v5 = vmul.f32 %v2300_v51, %v2286_v54  ;;  %v2323_v8 = vmul.f32 %v2296_v41, %v2285_v0  ;;  %v2326_v60 = vmul.f32 %v2308_v43, %v2288_v1  ;;  %v2325_v9 = vmul.f32 %v2304_v44, %v2287_v39  ;;  %v5139_v51 = vld [vmem:[%s6374_s5 + $0x2c8] ss:$16 sps:$4 sm:$0xff]   ;;  %v5144_v41 = vld [vmem:[%s6374_s5 + $0x2e4] ss:$16 sps:$4 sm:$0xff]   ;;  %v5147_v43 = vld [vmem:[%s6374_s5 + $0x2ec] ss:$16 sps:$4 sm:$0xff]  }
 0x3a0   :  { %v2328_v10 = vmul.f32 %v2316_v45, %v2290_v40  ;;  %v2327_v61 = vmul.f32 %v2312_v38, %v2289_v46  ;;  %v5136_v38 = vld [vmem:[%s6374_s5 + $0x2c0] ss:$16 sps:$4 sm:$0xff]   ;;  %v5145_v45 = vld [vmem:[%s6374_s5 + $0x2e8] ss:$16 sps:$4 sm:$0xff]   ;;  %v5159_v54 = vld [vmem:[%s6374_s5 + $0x32c] ss:$16 sps:$4 sm:$0xff]  }
 0x3a1   :  { %v2362_v62 = vadd.f32 %v2338_v49, %v2324_v5  ;;  %v2361_v58 = vadd.f32 %v2334_v50, %v2323_v8  ;;  %v5818_v12 = vadd.f32 %v2342_v53, %v2325_v9  ;;  %v2364_v63 = vadd.f32 %v2346_v52, %v2326_v60  ;;  %v5142_v44 = vld [vmem:[%s6374_s5 + $0x2e0] ss:$16 sps:$4 sm:$0xff]   ;;  %v5153_v49 = vld [vmem:[%s6374_s5 + $0x30c] ss:$16 sps:$4 sm:$0xff]   ;;  %v5151_v52 = vld [vmem:[%s6374_s5 + $0x308] ss:$16 sps:$4 sm:$0xff]  }
 0x3a2   :  { %v5820_v14 = vadd.f32 %v2354_v42, %v2328_v10  ;;  %v5822_v3 = vadd.f32 %v2350_v4, %v2327_v61  ;;  %v5148_v50 = vld [vmem:[%s6374_s5 + $0x300] ss:$16 sps:$4 sm:$0xff]   ;;  %v5156_v53 = vld [vmem:[%s6374_s5 + $0x324] ss:$16 sps:$4 sm:$0xff]   ;;  %v5157_v1 = vld [vmem:[%s6374_s5 + $0x328] ss:$16 sps:$4 sm:$0xff]  }
 0x3a3   :  { %v2368_v23 = vpack.c.bf16 %v2362_v62, %v2362_v62  ;;  %v2367_v15 = vpack.c.bf16 %v2361_v58, %v2361_v58  ;;  %v2370_v18 = vpack.c.bf16 %v2364_v63, %v2364_v63  ;;  %v5154_v0 = vld [vmem:[%s6374_s5 + $0x320] ss:$16 sps:$4 sm:$0xff]   ;;  %v5162_v39 = vld [vmem:[%s6374_s5 + $0x344] ss:$16 sps:$4 sm:$0xff]   ;;  %v5165_v40 = vld [vmem:[%s6374_s5 + $0x34c] ss:$16 sps:$4 sm:$0xff]  }
 0x3a4   :  { %v5160_v42 = vld [vmem:[%s6374_s5 + $0x340] ss:$16 sps:$4 sm:$0xff]   ;;  %v5163_v46 = vld [vmem:[%s6374_s5 + $0x348] ss:$16 sps:$4 sm:$0xff]   ;;  %v5168_v4 = vld [vmem:[%s6374_s5 + $0x364] ss:$16 sps:$4 sm:$0xff]  }
 0x3a5   :  { %3579 = vmatprep.mubr.bf16.mxu1 %v2368_v23  ;;  %3702 = vmatprep.mubr.bf16.mxu0 %v2368_v23  ;;  %v5171_v5 = vld [vmem:[%s6374_s5 + $0x36c] ss:$16 sps:$4 sm:$0xff]   ;;  %v5166_v8 = vld [vmem:[%s6374_s5 + $0x360] ss:$16 sps:$4 sm:$0xff]   ;;  %v5169_v60 = vld [vmem:[%s6374_s5 + $0x368] ss:$16 sps:$4 sm:$0xff]  }
 0x3a6   :  { %3580 = vmatmul.mubr.bf16.vlgmr.msra.gmra.mrb[8].mxu1 %v2367_v15  ;;  %3703 = vmatmul.mubr.bf16.vlgmr.msra.gmra.mrb[8].mxu0 %v2367_v15  ;;  %v5174_v9 = vld [vmem:[%s6374_s5 + $0x384] ss:$16 sps:$4 sm:$0xff]   ;;  %v5177_v10 = vld [vmem:[%s6374_s5 + $0x38c] ss:$16 sps:$4 sm:$0xff]   ;;  %v5172_v61 = vld [vmem:[%s6374_s5 + $0x380] ss:$16 sps:$4 sm:$0xff]  }
 0x3a7   :  { %3589 = vmatpush1.bf16.msra.mxu1 %v5100_v22  ;;  %3712 = vmatpush1.bf16.msra.mxu0 %v5103_v2  ;;  %v5175_v62 = vld [vmem:[%s6374_s5 + $0x388] ss:$16 sps:$4 sm:$0xff]   ;;  %v5180_v58 = vld [vmem:[%s6374_s5 + $0x3a4] ss:$16 sps:$4 sm:$0xff]   ;;  %v5183_v63 = vld [vmem:[%s6374_s5 + $0x3ac] ss:$16 sps:$4 sm:$0xff]  }
 0x3a8   :  { %3620 = vmatprep.mubr.bf16.mxu1 %v2370_v18  ;;  %3743 = vmatprep.mubr.bf16.mxu0 %v2370_v18  ;;  %v5178_v23 = vld [vmem:[%s6374_s5 + $0x3a0] ss:$16 sps:$4 sm:$0xff]   ;;  %v5181_v22 = vld [vmem:[%s6374_s5 + $0x3a8] ss:$16 sps:$4 sm:$0xff]   ;;  %v5186_v2 = vld [vmem:[%s6374_s5 + $0x3c4] ss:$16 sps:$4 sm:$0xff]  }
 0x3a9   :  { %3590 = vmatprep.subr.bf16.mxu1 %v5108_v16  ;;  %3713 = vmatprep.subr.bf16.mxu0 %v5111_v17  ;;  %v5189_v15 = vld [vmem:[%s6374_s5 + $0x3cc] ss:$16 sps:$4 sm:$0xff]   ;;  %v5184_v16 = vld [vmem:[%s6374_s5 + $0x3c0] ss:$16 sps:$4 sm:$0xff]   ;;  %v5187_v17 = vld [vmem:[%s6374_s5 + $0x3c8] ss:$16 sps:$4 sm:$0xff]  }
 0x3aa   :  { %v5192_v18 = vld [vmem:[%s6374_s5 + $0x3e4] ss:$16 sps:$4 sm:$0xff]  }
 0x3ab   :  { %3591 = vmatpush1.bf16.msra.mxu1 %v5106_v19  ;;  %3714 = vmatpush1.bf16.msra.mxu0 %v5109_v20  ;;  %v5195_v19 = vld [vmem:[%s6374_s5 + $0x3ec] ss:$16 sps:$4 sm:$0xff]   ;;  %v5190_v20 = vld [vmem:[%s6374_s5 + $0x3e0] ss:$16 sps:$4 sm:$0xff]  }
 0x3ac   :  { %3592 = vmatprep.subr.bf16.mxu1 %v5114_v21  ;;  %3715 = vmatprep.subr.bf16.mxu0 %v5117_v24  ;;  %v5193_v21 = vld [vmem:[%s6374_s5 + $0x3e8] ss:$16 sps:$4 sm:$0xff]   ;;  %v5198_v24 = vld [vmem:[%s6374_s5 + $0x404] ss:$16 sps:$4 sm:$0xff]  }
 0x3af   :  { %3593 = vmatpush1.bf16.msra.mxu1 %v5112_v25  ;;  %3716 = vmatpush1.bf16.msra.mxu0 %v5115_v26  ;;  %v5201_v25 = vld [vmem:[%s6374_s5 + $0x40c] ss:$16 sps:$4 sm:$0xff]   ;;  %v5196_v26 = vld [vmem:[%s6374_s5 + $0x400] ss:$16 sps:$4 sm:$0xff]  }
 0x3b0   :  { %3594 = vmatprep.subr.bf16.mxu1 %v5120_v27  ;;  %3717 = vmatprep.subr.bf16.mxu0 %v5123_v28  ;;  %v2369_v27 = vpack.c.bf16 %v5818_v12, %v5818_v12  ;;  %v5199_v28 = vld [vmem:[%s6374_s5 + $0x408] ss:$16 sps:$4 sm:$0xff]   ;;  %v5202_v12 = vld [vmem:[%s6374_s5 + $0x420] ss:$16 sps:$4 sm:$0xff]  }
 0x3b3   :  { %3595 = vmatpush1.bf16.msra.mxu1 %v5118_v29  ;;  %3718 = vmatpush1.bf16.msra.mxu0 %v5121_v30  ;;  %v2372_v29 = vpack.c.bf16 %v5820_v14, %v5820_v14  ;;  %v5204_v30 = vld [vmem:[%s6374_s5 + $0x424] ss:$16 sps:$4 sm:$0xff]   ;;  %v5205_v14 = vld [vmem:[%s6374_s5 + $0x428] ss:$16 sps:$4 sm:$0xff]  }
 0x3b4   :  { %3596 = vmatprep.subr.bf16.mxu1 %v5126_v31  ;;  %3719 = vmatprep.subr.bf16.mxu0 %v5129_v7  ;;  %v5207_v31 = vld [vmem:[%s6374_s5 + $0x42c] ss:$16 sps:$4 sm:$0xff]   ;;  %v5210_v7 = vld [vmem:[%s6374_s5 + $0x444] ss:$16 sps:$4 sm:$0xff]  }
 0x3b7   :  { %3597 = vmatpush1.bf16.msra.mxu1 %v5124_v47  ;;  %3720 = vmatpush1.bf16.msra.mxu0 %v5127_v6  ;;  %v5213_v47 = vld [vmem:[%s6374_s5 + $0x44c] ss:$16 sps:$4 sm:$0xff]   ;;  %v5208_v6 = vld [vmem:[%s6374_s5 + $0x440] ss:$16 sps:$4 sm:$0xff]  }
 0x3b8   :  { %3598 = vmatprep.subr.bf16.mxu1 %v5132_v34  ;;  %3721 = vmatprep.subr.bf16.mxu0 %v5135_v32  ;;  %v5211_v34 = vld [vmem:[%s6374_s5 + $0x448] ss:$16 sps:$4 sm:$0xff]   ;;  %v5216_v32 = vld [vmem:[%s6374_s5 + $0x464] ss:$16 sps:$4 sm:$0xff]  }
 0x3bb   :  { %3599 = vmatpush1.bf16.msra.mxu1 %v5130_v33  ;;  %3722 = vmatpush1.bf16.msra.mxu0 %v5133_v35  ;;  %v5219_v33 = vld [vmem:[%s6374_s5 + $0x46c] ss:$16 sps:$4 sm:$0xff]   ;;  %v5214_v35 = vld [vmem:[%s6374_s5 + $0x460] ss:$16 sps:$4 sm:$0xff]  }
 0x3bc   :  { %3600 = vmatprep.subr.bf16.mxu1 %v5138_v36  ;;  %3723 = vmatprep.subr.bf16.mxu0 %v5141_v37  ;;  %v5217_v36 = vld [vmem:[%s6374_s5 + $0x468] ss:$16 sps:$4 sm:$0xff]   ;;  %v5222_v37 = vld [vmem:[%s6374_s5 + $0x484] ss:$16 sps:$4 sm:$0xff]  }
 0x3bf   :  { %3601 = vmatpush1.bf16.msra.mxu1 %v5136_v38  ;;  %3724 = vmatpush1.bf16.msra.mxu0 %v5139_v51  ;;  %v5225_v38 = vld [vmem:[%s6374_s5 + $0x48c] ss:$16 sps:$4 sm:$0xff]   ;;  %v5220_v51 = vld [vmem:[%s6374_s5 + $0x480] ss:$16 sps:$4 sm:$0xff]  }
 0x3c0   :  { %3602 = vmatprep.subr.bf16.mxu1 %v5144_v41  ;;  %3725 = vmatprep.subr.bf16.mxu0 %v5147_v43  ;;  %v5223_v41 = vld [vmem:[%s6374_s5 + $0x488] ss:$16 sps:$4 sm:$0xff]   ;;  %v5228_v43 = vld [vmem:[%s6374_s5 + $0x4a4] ss:$16 sps:$4 sm:$0xff]  }
 0x3c3   :  { %3603 = vmatpush1.bf16.msra.mxu1 %v5142_v44  ;;  %3726 = vmatpush1.bf16.msra.mxu0 %v5145_v45  ;;  %v5231_v44 = vld [vmem:[%s6374_s5 + $0x4ac] ss:$16 sps:$4 sm:$0xff]   ;;  %v5226_v45 = vld [vmem:[%s6374_s5 + $0x4a0] ss:$16 sps:$4 sm:$0xff]  }
 0x3c4   :  { %3604 = vmatprep.subr.bf16.mxu1 %v5150_v48  ;;  %3727 = vmatprep.subr.bf16.mxu0 %v5153_v49  ;;  %v5229_v48 = vld [vmem:[%s6374_s5 + $0x4a8] ss:$16 sps:$4 sm:$0xff]   ;;  %v5234_v49 = vld [vmem:[%s6374_s5 + $0x4c4] ss:$16 sps:$4 sm:$0xff]  }
 0x3c7   :  { %3605 = vmatpush1.bf16.msra.mxu1 %v5148_v50  ;;  %3728 = vmatpush1.bf16.msra.mxu0 %v5151_v52  ;;  %v5237_v50 = vld [vmem:[%s6374_s5 + $0x4cc] ss:$16 sps:$4 sm:$0xff]   ;;  %v5232_v52 = vld [vmem:[%s6374_s5 + $0x4c0] ss:$16 sps:$4 sm:$0xff]  }
 0x3c8   :  { %3606 = vmatprep.subr.bf16.mxu1 %v5156_v53  ;;  %3729 = vmatprep.subr.bf16.mxu0 %v5159_v54  ;;  %v5235_v53 = vld [vmem:[%s6374_s5 + $0x4c8] ss:$16 sps:$4 sm:$0xff]   ;;  %v5240_v54 = vld [vmem:[%s6374_s5 + $0x4e4] ss:$16 sps:$4 sm:$0xff]  }
 0x3cb   :  { %3607 = vmatpush1.bf16.msra.mxu1 %v5154_v0  ;;  %3730 = vmatpush1.bf16.msra.mxu0 %v5157_v1  ;;  %v5243_v0 = vld [vmem:[%s6374_s5 + $0x4ec] ss:$16 sps:$4 sm:$0xff]   ;;  %v5238_v1 = vld [vmem:[%s6374_s5 + $0x4e0] ss:$16 sps:$4 sm:$0xff]  }
 0x3cc   :  { %3608 = vmatprep.subr.bf16.mxu1 %v5162_v39  ;;  %3731 = vmatprep.subr.bf16.mxu0 %v5165_v40  ;;  %v5241_v39 = vld [vmem:[%s6374_s5 + $0x4e8] ss:$16 sps:$4 sm:$0xff]   ;;  %v5246_v40 = vld [vmem:[%s6374_s5 + $0x504] ss:$16 sps:$4 sm:$0xff]  }
 0x3cf   :  { %3609 = vmatpush1.bf16.msra.mxu1 %v5160_v42  ;;  %3732 = vmatpush1.bf16.msra.mxu0 %v5163_v46  ;;  %v5249_v42 = vld [vmem:[%s6374_s5 + $0x50c] ss:$16 sps:$4 sm:$0xff]   ;;  %v5244_v46 = vld [vmem:[%s6374_s5 + $0x500] ss:$16 sps:$4 sm:$0xff]  }
 0x3d0   :  { %3610 = vmatprep.subr.bf16.mxu1 %v5168_v4  ;;  %3733 = vmatprep.subr.bf16.mxu0 %v5171_v5  ;;  %v5247_v4 = vld [vmem:[%s6374_s5 + $0x508] ss:$16 sps:$4 sm:$0xff]   ;;  %v5252_v5 = vld [vmem:[%s6374_s5 + $0x524] ss:$16 sps:$4 sm:$0xff]  }
 0x3d3   :  { %3611 = vmatpush1.bf16.msra.mxu1 %v5166_v8  ;;  %3734 = vmatpush1.bf16.msra.mxu0 %v5169_v60  ;;  %v5255_v8 = vld [vmem:[%s6374_s5 + $0x52c] ss:$16 sps:$4 sm:$0xff]   ;;  %v5250_v60 = vld [vmem:[%s6374_s5 + $0x520] ss:$16 sps:$4 sm:$0xff]  }
 0x3d4   :  { %3612 = vmatprep.subr.bf16.mxu1 %v5174_v9  ;;  %3735 = vmatprep.subr.bf16.mxu0 %v5177_v10  ;;  %v5253_v9 = vld [vmem:[%s6374_s5 + $0x528] ss:$16 sps:$4 sm:$0xff]   ;;  %v5258_v10 = vld [vmem:[%s6374_s5 + $0x544] ss:$16 sps:$4 sm:$0xff]  }
 0x3d7   :  { %3613 = vmatpush1.bf16.msra.mxu1 %v5172_v61  ;;  %3736 = vmatpush1.bf16.msra.mxu0 %v5175_v62  ;;  %v5261_v61 = vld [vmem:[%s6374_s5 + $0x54c] ss:$16 sps:$4 sm:$0xff]   ;;  %v5256_v62 = vld [vmem:[%s6374_s5 + $0x540] ss:$16 sps:$4 sm:$0xff]  }
 0x3d8   :  { %3614 = vmatprep.subr.bf16.mxu1 %v5180_v58  ;;  %3737 = vmatprep.subr.bf16.mxu0 %v5183_v63  ;;  %v5259_v58 = vld [vmem:[%s6374_s5 + $0x548] ss:$16 sps:$4 sm:$0xff]   ;;  %v5264_v63 = vld [vmem:[%s6374_s5 + $0x564] ss:$16 sps:$4 sm:$0xff]  }
 0x3db   :  { %3615 = vmatpush1.bf16.msra.mxu1 %v5178_v23  ;;  %3738 = vmatpush1.bf16.msra.mxu0 %v5181_v22  ;;  %v5267_v23 = vld [vmem:[%s6374_s5 + $0x56c] ss:$16 sps:$4 sm:$0xff]   ;;  %v5262_v22 = vld [vmem:[%s6374_s5 + $0x560] ss:$16 sps:$4 sm:$0xff]  }
 0x3dc   :  { %3616 = vmatprep.subr.bf16.mxu1 %v5186_v2  ;;  %3739 = vmatprep.subr.bf16.mxu0 %v5189_v15  ;;  %v5265_v2 = vld [vmem:[%s6374_s5 + $0x568] ss:$16 sps:$4 sm:$0xff]   ;;  %v5270_v15 = vld [vmem:[%s6374_s5 + $0x584] ss:$16 sps:$4 sm:$0xff]  }
 0x3df   :  { %3617 = vmatpush1.bf16.msra.mxu1 %v5184_v16  ;;  %3740 = vmatpush1.bf16.msra.mxu0 %v5187_v17  ;;  %v5273_v16 = vld [vmem:[%s6374_s5 + $0x58c] ss:$16 sps:$4 sm:$0xff]   ;;  %v5268_v17 = vld [vmem:[%s6374_s5 + $0x580] ss:$16 sps:$4 sm:$0xff]  }
 0x3e0   :  { %3618 = vmatprep.subr.bf16.mxu1 %v5192_v18  ;;  %3741 = vmatprep.subr.bf16.mxu0 %v5195_v19  ;;  %v5271_v18 = vld [vmem:[%s6374_s5 + $0x588] ss:$16 sps:$4 sm:$0xff]   ;;  %v5276_v19 = vld [vmem:[%s6374_s5 + $0x5a4] ss:$16 sps:$4 sm:$0xff]  }
 0x3e3   :  { %3619 = vmatpush1.bf16.msra.mxu1 %v5190_v20  ;;  %3742 = vmatpush1.bf16.msra.mxu0 %v5193_v21  ;;  %v5279_v20 = vld [vmem:[%s6374_s5 + $0x5ac] ss:$16 sps:$4 sm:$0xff]   ;;  %v5274_v21 = vld [vmem:[%s6374_s5 + $0x5a0] ss:$16 sps:$4 sm:$0xff]  }
 0x3e4   :  { %3629 = vmatprep.subr.bf16.mxu1 %v5198_v24  ;;  %3752 = vmatprep.subr.bf16.mxu0 %v5201_v25  ;;  %v5277_v24 = vld [vmem:[%s6374_s5 + $0x5a8] ss:$16 sps:$4 sm:$0xff]   ;;  %v5282_v25 = vld [vmem:[%s6374_s5 + $0x5c4] ss:$16 sps:$4 sm:$0xff]  }
 0x3e6   :  { %3621 = vmatmul.mubr.bf16.vlgmr.msra.gmra.mrb[8].mxu1 %v2369_v27  ;;  %3744 = vmatmul.mubr.bf16.vlgmr.msra.gmra.mrb[8].mxu0 %v2369_v27  ;;  %v5280_v27 = vld [vmem:[%s6374_s5 + $0x5c0] ss:$16 sps:$4 sm:$0xff]  }
 0x3e7   :  { %3630 = vmatpush1.bf16.msra.mxu1 %v5196_v26  ;;  %3661 = vmatprep.mubr.bf16.mxu1 %v2372_v29  ;;  %v5285_v26 = vld [vmem:[%s6374_s5 + $0x5cc] ss:$16 sps:$4 sm:$0xff]  }
 0x3e8   :  { %3753 = vmatpush1.bf16.msra.mxu0 %v5199_v28  ;;  %3784 = vmatprep.mubr.bf16.mxu0 %v2372_v29  ;;  %v5283_v28 = vld [vmem:[%s6374_s5 + $0x5c8] ss:$16 sps:$4 sm:$0xff]   ;;  %v5288_v29 = vld [vmem:[%s6374_s5 + $0x5e4] ss:$16 sps:$4 sm:$0xff]  }
 0x3e9   :  { %3631 = vmatprep.subr.bf16.mxu1 %v5204_v30  ;;  %3754 = vmatprep.subr.bf16.mxu0 %v5207_v31  ;;  %v5291_v30 = vld [vmem:[%s6374_s5 + $0x5ec] ss:$16 sps:$4 sm:$0xff]   ;;  %v5286_v31 = vld [vmem:[%s6374_s5 + $0x5e0] ss:$16 sps:$4 sm:$0xff]  }
 0x3eb   :  { %3632 = vmatpush1.bf16.msra.mxu1 %v5202_v12  ;;  %v5289_v12 = vld [vmem:[%s6374_s5 + $0x5e8] ss:$16 sps:$4 sm:$0xff]  }
 0x3ec   :  { %3755 = vmatpush1.bf16.msra.mxu0 %v5205_v14  ;;  %3633 = vmatprep.subr.bf16.mxu1 %v5210_v7  ;;  %v2371_v14 = vpack.c.bf16 %v5822_v3, %v5822_v3  ;;  %v6209_v7 = vand.u32 127, %v364_v55  ;;  %v3871_v3 = vstv %s4499_s3 }
 0x3ed   :  { %3756 = vmatprep.subr.bf16.mxu0 %v5213_v47  ;;  %v2565_v47 = vld [vmem:[#allocation6] sm:$0xf] }
 0x3ee   :  { %v2574_v55 = vrot.slane %v2565_v47, %v5528_v59  ;;  %vm3872_vm1 = vcmp.eq.s32.totalorder %v6209_v7, %v3871_v3 }
 0x3ef   :  { %3634 = vmatpush1.bf16.msra.mxu1 %v5208_v6  ;;  %v6212_v6 = vadd.s32 256, %v6209_v7 }
 0x3f0   :  { %3757 = vmatpush1.bf16.msra.mxu0 %v5211_v34  ;;  %3635 = vmatprep.subr.bf16.mxu1 %v5216_v32  ;;  %v6215_v34 = vadd.s32 128, %v6209_v7  ;;  %v6218_v32 = vadd.s32 384, %v6209_v7 }
 0x3f1   :  { %3758 = vmatprep.subr.bf16.mxu0 %v5219_v33  ;;  %v3843_v33 = vstv %s3842_s4  ;;  %vm3874_vm2 = vcmp.eq.s32.totalorder %v6212_v6, %v3871_v3 }
 0x3f2   :  { %vm3873_vm3 = vcmp.eq.s32.totalorder %v6215_v34, %v3871_v3  ;;  %vm3875_vm4 = vcmp.eq.s32.totalorder %v6218_v32, %v3871_v3  ;;  %vm3844_vm5 = vcmp.eq.s32.totalorder %v6209_v7, %v3843_v33  ;;  %vm3845_vm6 = vcmp.eq.s32.totalorder %v6215_v34, %v3843_v33 }
 0x3f3   :  { %3636 = vmatpush1.bf16.msra.mxu1 %v5214_v35  ;;  %v2570_v35 = vrot.slane %v2565_v47, %v5522_v57  ;;  %v6231_v57 = vstv %s4501_s29  ;;  %vm3846_vm7 = vcmp.eq.s32.totalorder %v6212_v6, %v3843_v33  ;;  %vm3847_vm8 = vcmp.eq.s32.totalorder %v6218_v32, %v3843_v33 }
 0x3f4   :  { %3759 = vmatpush1.bf16.msra.mxu0 %v5217_v36  ;;  %3637 = vmatprep.subr.bf16.mxu1 %v5222_v37  ;;  %v2578_v36 = vrot.slane %v2565_v47, %v5533_v11  ;;  %v6223_v37 = vstv %s4500_s28  ;;  %vm3950_vm13 = vcmp.eq.s32.totalorder %v6209_v7, %v6231_v57  ;;  %vm3952_vm15 = vcmp.eq.s32.totalorder %v6212_v6, %v6231_v57 }
 0x3f5   :  { %3760 = vmatprep.subr.bf16.mxu0 %v5225_v38  ;;  %v2582_v38 = vrot.slane %v2565_v47, %v5537_v13  ;;  %vm3911_vm9 = vcmp.eq.s32.totalorder %v6209_v7, %v6223_v37  ;;  %vm3912_vm10 = vcmp.eq.s32.totalorder %v6215_v34, %v6223_v37  ;;  %vm3913_vm11 = vcmp.eq.s32.totalorder %v6212_v6, %v6223_v37 }
 0x3f6   :  { %vm3914_vm12 = vcmp.eq.s32.totalorder %v6218_v32, %v6223_v37  ;;  %vm3953_vm14 = vcmp.eq.s32.totalorder %v6218_v32, %v6231_v57 }
 0x3f7   :  { %3638 = vmatpush1.bf16.msra.mxu1 %v5220_v51 }
 0x3f8   :  { %3761 = vmatpush1.bf16.msra.mxu0 %v5223_v41  ;;  %3639 = vmatprep.subr.bf16.mxu1 %v5228_v43 }
 0x3f9   :  { %3762 = vmatprep.subr.bf16.mxu0 %v5231_v44 }
 0x3fb   :  { %3640 = vmatpush1.bf16.msra.mxu1 %v5226_v45 }
 0x3fc   :  { %3763 = vmatpush1.bf16.msra.mxu0 %v5229_v48  ;;  %3641 = vmatprep.subr.bf16.mxu1 %v5234_v49 }
 0x3fd   :  { %3764 = vmatprep.subr.bf16.mxu0 %v5237_v50 }
 0x3ff   :  { %3642 = vmatpush1.bf16.msra.mxu1 %v5232_v52 }
 0x400   :  { %3765 = vmatpush1.bf16.msra.mxu0 %v5235_v53  ;;  %3643 = vmatprep.subr.bf16.mxu1 %v5240_v54 }
 0x401   :  { %3766 = vmatprep.subr.bf16.mxu0 %v5243_v0 }
 0x403   :  { %3644 = vmatpush1.bf16.msra.mxu1 %v5238_v1 }
 0x404   :  { %3767 = vmatpush1.bf16.msra.mxu0 %v5241_v39  ;;  %3645 = vmatprep.subr.bf16.mxu1 %v5246_v40 }
 0x405   :  { %3768 = vmatprep.subr.bf16.mxu0 %v5249_v42 }
 0x407   :  { %3646 = vmatpush1.bf16.msra.mxu1 %v5244_v46 }
 0x408   :  { %3769 = vmatpush1.bf16.msra.mxu0 %v5247_v4  ;;  %3647 = vmatprep.subr.bf16.mxu1 %v5252_v5 }
 0x409   :  { %3770 = vmatprep.subr.bf16.mxu0 %v5255_v8 }
 0x40b   :  { %3648 = vmatpush1.bf16.msra.mxu1 %v5250_v60 }
 0x40c   :  { %3771 = vmatpush1.bf16.msra.mxu0 %v5253_v9  ;;  %3649 = vmatprep.subr.bf16.mxu1 %v5258_v10 }
 0x40d   :  { %3772 = vmatprep.subr.bf16.mxu0 %v5261_v61 }
 0x40f   :  { %3650 = vmatpush1.bf16.msra.mxu1 %v5256_v62 }
 0x410   :  { %3773 = vmatpush1.bf16.msra.mxu0 %v5259_v58  ;;  %3651 = vmatprep.subr.bf16.mxu1 %v5264_v63 }
 0x411   :  { %3774 = vmatprep.subr.bf16.mxu0 %v5267_v23 }
 0x413   :  { %3652 = vmatpush1.bf16.msra.mxu1 %v5262_v22 }
 0x414   :  { %3775 = vmatpush1.bf16.msra.mxu0 %v5265_v2  ;;  %3653 = vmatprep.subr.bf16.mxu1 %v5270_v15 }
 0x415   :  { %3776 = vmatprep.subr.bf16.mxu0 %v5273_v16 }
 0x417   :  { %3654 = vmatpush1.bf16.msra.mxu1 %v5268_v17 }
 0x418   :  { %3777 = vmatpush1.bf16.msra.mxu0 %v5271_v18  ;;  %3655 = vmatprep.subr.bf16.mxu1 %v5276_v19 }
 0x419   :  { %3778 = vmatprep.subr.bf16.mxu0 %v5279_v20 }
 0x41b   :  { %3656 = vmatpush1.bf16.msra.mxu1 %v5274_v21 }
 0x41c   :  { %3779 = vmatpush1.bf16.msra.mxu0 %v5277_v24  ;;  %3657 = vmatprep.subr.bf16.mxu1 %v5282_v25 }
 0x41d   :  { %3780 = vmatprep.subr.bf16.mxu0 %v5285_v26 }
 0x41f   :  { %3658 = vmatpush1.bf16.msra.mxu1 %v5280_v27 }
 0x420   :  { %3781 = vmatpush1.bf16.msra.mxu0 %v5283_v28  ;;  %3659 = vmatprep.subr.bf16.mxu1 %v5288_v29 }
 0x421   :  { %3782 = vmatprep.subr.bf16.mxu0 %v5291_v30 }
 0x423   :  { %3660 = vmatpush1.bf16.msra.mxu1 %v5286_v31 }
 0x424   :  { %3783 = vmatpush1.bf16.msra.mxu0 %v5289_v12 }
 0x426   :  { %3662 = vmatmul.mubr.bf16.vlgmr.msra.gmra.mrb[8].mxu1 %v2371_v14 }
 0x427   :  { %3785 = vmatmul.mubr.bf16.vlgmr.msra.gmra.mrb[8].mxu0 %v2371_v14 }
 0x4f9   :  { %v3663_v11 = vpop.f32.mrb[8].mxu1 }
 0x4fa   :  { %v6238_v59 = vadd.f32 %v3663_v11, %v2570_v35  ;;  %v3786_v13 = vpop.f32.mrb[8].mxu0  ;;  %v3665_v51 = vpop.f32.mrb[9].mxu1 }
 0x4fb   :  { %v6246_v41 = vadd.f32 %v3786_v13, %v2578_v36  ;;  %v6248_v43 = vadd.f32 %v3665_v51, %v2574_v55  ;;  %v3788_v44 = vpop.f32.mrb[9].mxu0  ;;  %v3667_v45 = vpop.f32.mrb[10].mxu1 }
 0x4fc   :  { %3793 = vst [vmem:[%s6377_s8] sm:$0xff] %v6238_v59  ;;  %v6258_v48 = vadd.f32 %v3788_v44, %v2582_v38  ;;  %v3790_v49 = vpop.f32.mrb[10].mxu0  ;;  %v3668_v50 = vpop.f32.mrb[11].mxu1  ;;  %v3876_v52 = vsel %vm3872_vm1, %v6238_v59, 0.0  ;;  %v3848_v53 = vsel %vm3844_vm5, %v6238_v59, 0.0  ;;  %v3915_v54 = vsel %vm3911_vm9, %v6238_v59, 0.0 }
 0x4fd   :  { %3795 = vst [vmem:[%s6377_s8 + $0x10] sm:$0xff] %v6246_v41  ;;  %3794 = vst [vmem:[%s6377_s8 + $0x8] sm:$0xff] %v6248_v43  ;;  %v3791_v0 = vpop.f32.mrb[11].mxu0  ;;  %v3797_v1 = vmax.f32 %v6238_v59, %v6248_v43  ;;  %v3877_v39 = vsel %vm3873_vm3, %v6248_v43, 0.0  ;;  %v3878_v40 = vsel %vm3874_vm2, %v6246_v41, 0.0  ;;  %v3884_v42 = vrot.slane %v3876_v52, 1 }
 0x4fe   :  { %3796 = vst [vmem:[%s6377_s8 + $0x18] sm:$0xff] %v6258_v48  ;;  %v3798_v46 = vmax.f32 %v6246_v41, %v6258_v48  ;;  %v3879_v4 = vsel %vm3875_vm4, %v6258_v48, 0.0  ;;  %v3885_v5 = vrot.slane %v3877_v39, 1  ;;  %v3886_v8 = vrot.slane %v3878_v40, 1 }
 0x4ff   :  { %v3887_v60 = vrot.slane %v3879_v4, 1  ;;  %v3892_v9 = vsel %vm3852_vm0, %v3884_v42, 0.0  ;;  %v3849_v10 = vsel %vm3845_vm6, %v6248_v43, 0.0  ;;  %v3850_v61 = vsel %vm3846_vm7, %v6246_v41, 0.0 }
 0x500   :  { %v3799_v62 = vmax.f32 %v3797_v1, %v3798_v46  ;;  %v3893_v58 = vsel %vm3852_vm0, %v3885_v5, 0.0  ;;  %v3895_v63 = vsel %vm3852_vm0, %v3886_v8, 0.0  ;;  %v3851_v23 = vsel %vm3847_vm8, %v6258_v48, 0.0 }
 0x501   :  { %v3894_v22 = vadd.f32 %v3893_v58, %v3892_v9  ;;  %v3897_v2 = vsel %vm3852_vm0, %v3887_v60, 0.0  ;;  %v3853_v15 = vsel %vm3852_vm0, %v3848_v53, 0.0  ;;  %v3854_v16 = vsel %vm3852_vm0, %v3849_v10, 0.0 }
 0x502   :  { %3800 = vmax.xlane.f32.xlu1 %v3799_v62  ;;  %v3855_v17 = vadd.f32 %v3854_v16, %v3853_v15  ;;  %v3856_v18 = vsel %vm3852_vm0, %v3850_v61, 0.0  ;;  %v3858_v19 = vsel %vm3852_vm0, %v3851_v23, 0.0  ;;  %v3916_v20 = vsel %vm3912_vm10, %v6248_v43, 0.0 }
 0x503   :  { %v3896_v21 = vadd.f32 %v3895_v63, %v3894_v22  ;;  %v3917_v24 = vsel %vm3913_vm11, %v6246_v41, 0.0  ;;  %v3918_v25 = vsel %vm3914_vm12, %v6258_v48, 0.0  ;;  %v3923_v26 = vrot.slane %v3915_v54, 2 }
 0x504   :  { %v3857_v27 = vadd.f32 %v3856_v18, %v3855_v17  ;;  %v3924_v28 = vrot.slane %v3916_v20, 2  ;;  %v3925_v29 = vrot.slane %v3917_v24, 2  ;;  %v3926_v30 = vrot.slane %v3918_v25, 2 }
 0x505   :  { %v3898_v31 = vadd.f32 %v3897_v2, %v3896_v21  ;;  %v3931_v12 = vsel %vm3852_vm0, %v3923_v26, 0.0  ;;  %v3954_v14 = vsel %vm3950_vm13, %v6238_v59, 0.0  ;;  %vm6379_vm1 = vcmp.eq.s32.totalorder %v6215_v34, %v6231_v57 }
 0x506   :  { %v3955_v47 = vsel %vm6379_vm1, %v6248_v43, 0.0  ;;  %v3859_v3 = vadd.f32 %v3858_v19, %v3857_v27  ;;  %v3932_v33 = vsel %vm3852_vm0, %v3924_v28, 0.0  ;;  %v3934_v35 = vsel %vm3852_vm0, %v3925_v29, 0.0 }
 0x507   :  { %v3936_v36 = vsel %vm3852_vm0, %v3926_v30, 0.0  ;;  %3899 = vadd.xlane.f32.xlu0 %v3898_v31  ;;  %v3933_v55 = vadd.f32 %v3932_v33, %v3931_v12  ;;  %v3956_v7 = vsel %vm3952_vm15, %v6246_v41, 0.0  ;;  %v3957_v34 = vsel %vm3953_vm14, %v6258_v48, 0.0 }
 0x508   :  { %v3962_v37 = vrot.slane %v3954_v14, 3  ;;  %v3963_v38 = vrot.slane %v3955_v47, 3  ;;  %v3964_v11 = vrot.slane %v3956_v7, 3  ;;  %v3965_v13 = vrot.slane %v3957_v34, 3 }
 0x509   :  { %v3935_v51 = vadd.f32 %v3934_v35, %v3933_v55  ;;  %vm3826_vm2 = vcmask 7168  }
 0x50a   :  { %v3970_v44 = vsel %vm3852_vm0, %v3962_v37, 0.0  ;;  %v3971_v45 = vsel %vm3852_vm0, %v3963_v38, 0.0  ;;  %v3973_v49 = vsel %vm3852_vm0, %v3964_v11, 0.0  ;;  %v3975_v50 = vsel %vm3852_vm0, %v3965_v13, 0.0 }
 0x50b   :  { %v3937_v6 = vadd.f32 %v3936_v36, %v3935_v51  ;;  %v3972_v52 = vadd.f32 %v3971_v45, %v3970_v44  ;;  %vm3824_vm0 = vcmp.lt.s32.totalorder %v5519_v56, 4 }
 0x50d   :  { %v3974_v53 = vadd.f32 %v3973_v49, %v3972_v52 }
 0x50f   :  { %v3976_v54 = vadd.f32 %v3975_v50, %v3974_v53 }
 0x58f   :  { %v3801_v0 = vpop.xlane.xlu1 %3800 }
 0x590   :  { %v3802_v32 = vsub.f32 %v6238_v59, %v3801_v0  ;;  %v3803_v57 = vsub.f32 %v6248_v43, %v3801_v0  ;;  %v3804_v1 = vsub.f32 %v6246_v41, %v3801_v0  ;;  %v3805_v39 = vsub.f32 %v6258_v48, %v3801_v0 }
 0x592   :  { %v3806_v40 = vmul.f32 1.442695, %v3802_v32  ;;  %v3808_v42 = vmul.f32 1.442695, %v3803_v57  ;;  %v3810_v46 = vmul.f32 1.442695, %v3804_v1 }
 0x593   :  { %v3812_v4 = vmul.f32 1.442695, %v3805_v39 }
 0x594   :  { %5306 = vpow2.f32 %v3806_v40  ;;  %v3900_v22 = vpop.xlane.xlu0 %3899 }
 0x595   :  { %5308 = vpow2.f32 %v3808_v42  ;;  %v3901_v16 = vrot.slane %v3900_v22, 4 }
 0x596   :  { %5310 = vpow2.f32 %v3810_v46 }
 0x597   :  { %5312 = vpow2.f32 %v3812_v4  ;;  %v3902_v19 = vadd.f32 %v3901_v16, %v3900_v22 }
 0x599   :  { %v3903_v25 = vrot.slane %v3902_v19, 2 }
 0x59b   :  { %v3904_v12 = vadd.f32 %v3903_v25, %v3902_v19 }
 0x59d   :  { %v3905_v55 = vrot.slane %v3904_v12, 1 }
 0x59e   :  { %v5307_v5 = vpop.eup %5306 }
 0x59f   :  { %v5309_v8 = vpop.eup %5308  ;;  %v3906_v11 = vadd.f32 %v3905_v55, %v3904_v12 }
 0x5a0   :  { %v3814_v60 = vadd.f32 %v5309_v8, %v5307_v5  ;;  %v5311_v9 = vpop.eup %5310 }
 0x5a1   :  { %v5313_v59 = vpop.eup %5312 }
 0x5a2   :  { %v3815_v10 = vadd.f32 %v5311_v9, %v3814_v60 }
 0x5a4   :  { %v3816_v61 = vadd.f32 %v5313_v59, %v3815_v10 }
 0x5a6   :  { %3817 = vadd.xlane.f32.xlu1 %v3816_v61 }
 0x5aa   :  { %3860 = vadd.xlane.f32.xlu1 %v3859_v3 }
 0x5ae   :  { %3938 = vadd.xlane.f32.xlu1 %v3937_v6 }
 0x633   :  { %v3818_v41 = vpop.xlane.xlu1 %3817 }
 0x634   :  { %5314 = vlog2.f32 %v3818_v41 }
 0x637   :  { %v3861_v23 = vpop.xlane.xlu1 %3860 }
 0x638   :  { %v3862_v15 = vrot.slane %v3861_v23, 4 }
 0x63a   :  { %v3863_v18 = vadd.f32 %v3862_v15, %v3861_v23 }
 0x63b   :  { %v3939_v2 = vpop.xlane.xlu1 %3938 }
 0x63c   :  { %v3940_v17 = vrot.slane %v3939_v2, 4  ;;  %v3864_v21 = vrot.slane %v3863_v18, 2 }
 0x63e   :  { %v5315_v43 = vpop.eup %5314  ;;  %v3941_v20 = vadd.f32 %v3940_v17, %v3939_v2  ;;  %v3865_v29 = vadd.f32 %v3864_v21, %v3863_v18 }
 0x63f   :  { %v3820_v48 = vmul.f32 0.6931472, %v5315_v43 }
 0x640   :  { %v3942_v56 = vrot.slane %v3941_v20, 2  ;;  %v3866_v33 = vrot.slane %v3865_v29, 1 }
 0x641   :  { %v3821_v62 = vadd.f32 %v3820_v48, %v3801_v0 }
 0x642   :  { %v3943_v14 = vadd.f32 %v3942_v56, %v3941_v20  ;;  %v3867_v38 = vadd.f32 %v3866_v33, %v3865_v29 }
 0x643   :  { %v3825_v58 = vsel %vm3824_vm0, %v3821_v62, 0.0 }
 0x644   :  { %v3827_v63 = vsel %vm3826_vm2, %v3825_v58, 0.0  ;;  %v3944_v7 = vrot.slane %v3943_v14, 1 }
 0x645   :  { %3828 = vadd.xlane.f32.xlu0 %v3827_v63 }
 0x646   :  { %v3945_v51 = vadd.f32 %v3944_v7, %v3943_v14 }
 0x649   :  { %3977 = vadd.xlane.f32.xlu0 %v3976_v54 }
 0x6d2   :  { %v3829_v24 = vpop.xlane.xlu0 %3828 }
 0x6d3   :  { %v3830_v26 = vrot.slane %v3829_v24, 4 }
 0x6d5   :  { %v3831_v27 = vadd.f32 %v3830_v26, %v3829_v24 }
 0x6d6   :  { %v3978_v28 = vpop.xlane.xlu0 %3977 }
 0x6d7   :  { %v3832_v30 = vrot.slane %v3831_v27, 2  ;;  %v3979_v31 = vrot.slane %v3978_v28, 4 }
 0x6d9   :  { %v3980_v47 = vadd.f32 %v3979_v31, %v3978_v28  ;;  %v3833_v3 = vadd.f32 %v3832_v30, %v3831_v27 }
 0x6db   :  { %v3981_v35 = vrot.slane %v3980_v47, 2  ;;  %v3834_v36 = vrot.slane %v3833_v3, 1 }
 0x6dd   :  { %v3982_v34 = vadd.f32 %v3981_v35, %v3980_v47  ;;  %v3835_v37 = vadd.f32 %v3834_v36, %v3833_v3 }
 0x6df   :  { %4550 = vpush %v3835_v37  ;;  %v3983_v13 = vrot.slane %v3982_v34, 1 }
 0x6e0   :  { %4552 = vpush %v3867_v38 }
 0x6e1   :  { %4554 = vpush %v3906_v11  ;;  %v3984_v44 = vadd.f32 %v3983_v13, %v3982_v34 }
 0x6e2   :  { %4556 = vpush %v3945_v51 }
 0x6e3   :  { %4558 = vpush %v3984_v44 }
 0x710   :  { %s4551_s8 = spop %4550 }
 0x711   :  { %s4553_s10 = spop %4552 }
 0x712   :  { %s4555_s15 = spop %4554 }
 0x713   :  { %s3908_s16 = sadd.f32 %s4555_s15, %s4553_s10  ;;  %s4557_s6 = spop %4556 }
 0x714   :  { %s4559_s17 = spop %4558 }
 0x715   :  { %s3947_s18 = sadd.f32 %s4557_s6, %s3908_s16 }
 0x717   :  { %s3986_s19 = sadd.f32 %s4559_s17, %s3947_s18 }
 0x719   :  { %s3987_s20 = ssub.f32 %s4551_s8, %s3986_s19 }
 0x71b   :  { %s3990_s21 = smul.f32 0.25, %s3987_s20 }
 0x71d   :  { %3992 = sst [smem:[#allocation9]] %s3990_s21 }
 0x71e   :  { %5381 = shalt.err (!%p5378_p9)
}
 0x71f   :  { %s5395_s27 = smov [#allocation9]  }
 0x720   :  { %4002 = dma.smem_to_hbm %s5395_s27, 16, %s6378_s9, [#allocation4]  }
 0x721   :  { %5388 = dma.done.wait [#allocation4], 16  }
 0x722   :  { %5389 = vsyncadd [#allocation4], 4294967280 }
 0x723   :  { %4008 = sfence }
 0x724   :  { %4009 = vsyncpa [#allocation3], 1 }
 0x725   :  { %4010 = vsyncpa [#allocation7], 1 }
 0x726   :  { %4011 = vsyncpa [#allocation4], 1 }
 0x727   :  { %4012 = vsyncpa [#allocation5], 1 }

</bundles_post_ra>
